<compile_context>
chip_gen: v6e
topology: v6e:2x2x1
jax: 0.10.0
libtpu: 0.0.40
codegen_flags: <defaults>
</compile_context>

<pallas_src>
import jax
import jax.numpy as jnp
from jax.experimental import pallas as pl
from jax.experimental.pallas import tpu as pltpu


def _se_conv1x1_kernel(w_ref, g_ref, x_ref, o_ref):
    # w_ref: (Cout, Cin) f32   -- 1x1 conv weight
    # g_ref: (1, Cin, 1) f32   -- sigmoid(gate) row for this batch element
    # x_ref: (1, Cin, ts) f32  -- channels-first tile, spatial on lanes
    # o_ref: (1, Cout, ts)
    xg = x_ref[0] * g_ref[0]                      # (Cin, ts) * (Cin, 1): exact f32 gate mul
    o_ref[0] = jnp.dot(
        w_ref[...], xg, preferred_element_type=jnp.float32
    ).astype(o_ref.dtype)                         # (Cout, ts), MXU with f32 accumulation


def sigmoid_mul_conv1x1(x_nchw, gate_nc11, w_oihw, *, ts=1024):
    """conv1x1(x * sigmoid(gate)) fused into one Pallas kernel.

    x_nchw:    (N, Cin, H, W)
    gate_nc11: (Ng, Cin, 1, 1) with Ng == 1 (module case) or Ng == N (per-sample SE gate)
    w_oihw:    (Cout, Cin, 1, 1)
    returns    (N, Cout, H, W)
    """
    N, Cin, H, W = x_nchw.shape
    Cout = w_oihw.shape[0]
    HW = H * W

    # Tiny sigmoid in the wrapper; broadcast to one gate row per sample.
    g = jax.nn.sigmoid(gate_nc11.astype(jnp.float32)).reshape(gate_nc11.shape[0], Cin, 1)
    g = jnp.broadcast_to(g, (N, Cin, 1))

    # Channels-first matrix views; reshapes only (no transpose, no extra HBM pass).
    x3 = x_nchw.reshape(N, Cin, HW)
    w2 = w_oihw.reshape(Cout, Cin).astype(jnp.float32)

    # Spatial (lane) tile: full-dim block if the image is smaller than the tile,
    # otherwise a 128-aligned tile with the ragged last block handled by cdiv.
    ts_eff = HW if HW < ts else ts
    grid = (N, pl.cdiv(HW, ts_eff))

    itemsize = jnp.dtype(x_nchw.dtype).itemsize
    cost = pl.CostEstimate(
        flops=2 * N * Cout * Cin * HW,
        transcendentals=0,
        bytes_accessed=(x3.size + w2.size + g.size) * 4 + N * Cout * HW * itemsize,
    )

    out3 = pl.pallas_call(
        _se_conv1x1_kernel,
        out_shape=jax.ShapeDtypeStruct((N, Cout, HW), x_nchw.dtype),
        grid=grid,
        in_specs=[
            pl.BlockSpec((Cout, Cin), lambda n, s: (0, 0)),       # weight, resident
            pl.BlockSpec((1, Cin, 1), lambda n, s: (n, 0, 0)),    # per-sample gate row
            pl.BlockSpec((1, Cin, ts_eff), lambda n, s: (n, 0, s)),
        ],
        out_specs=pl.BlockSpec((1, Cout, ts_eff), lambda n, s: (n, 0, s)),
        compiler_params=pltpu.CompilerParams(
            dimension_semantics=("parallel", "parallel")),
        cost_estimate=cost,
    )(w2, g, x3)

    return out3.reshape(N, Cout, H, W)


if __name__ == "__main__":
    key = jax.random.PRNGKey(0)
    k1, k2, k3 = jax.random.split(key, 3)

    # Module-implied channel sizes (Conv2d(288, 48, 1x1, bias=False)); small spatial
    # chosen so the tiled + ragged spatial path is exercised (HW=1600 -> 2 blocks).
    N, Cin, Cout, H, W = 1, 288, 48, 40, 40

    x119 = jax.random.normal(k1, (N, Cin, H, W), dtype=jnp.float32)   # feature map
    x123 = jax.random.normal(k2, (1, Cin, 1, 1), dtype=jnp.float32)   # SE gate logits
    w = jax.random.normal(k3, (Cout, Cin, 1, 1), dtype=jnp.float32) * (1.0 / (Cin ** 0.5))

    out = sigmoid_mul_conv1x1(x119, x123, w)
    out = jax.block_until_ready(out)

    # Reference (exact module semantics: sigmoid -> mul -> 1x1 conv).
    ref = jnp.einsum(
        "nchw,oc->nohw",
        x119 * jax.nn.sigmoid(x123),
        w.reshape(Cout, Cin),
    )
    assert out.shape == (N, Cout, H, W), out.shape
    assert jnp.allclose(out, ref, atol=2e-2, rtol=2e-2), float(jnp.max(jnp.abs(out - ref)))

    print("KERNEL_OK")
</pallas_src>

<mosaic_0001>
module attributes {stable_mosaic.version = 11 : i64} {
  func.func @_se_conv1x1_kernel(%arg0: i32, %arg1: i32, %arg2: memref<48x288xf32, #tpu.memory_space<vmem>>, %arg3: memref<1x288x1xf32, #tpu.memory_space<vmem>>, %arg4: memref<1x288x1024xf32, #tpu.memory_space<vmem>>, %arg5: memref<1x48x1024xf32, #tpu.memory_space<vmem>>) attributes {dimension_semantics = [#tpu.dimension_semantics<parallel>, #tpu.dimension_semantics<parallel>], iteration_bounds = array<i64: 1, 2>, scalar_prefetch = 0 : i64, scratch_operands = 0 : i64, tpu.core_type = #tpu.core_type<tc>, window_params = [{pipeline_mode = #tpu.pipeline_mode<synchronous>, transform_indices = @transform_0, window_bounds = array<i64: 48, 288>}, {transform_indices = @transform_1, window_bounds = array<i64: 1, 288, 1>}, {transform_indices = @transform_2, window_bounds = array<i64: 1, 288, 1024>}, {transform_indices = @transform_3, window_bounds = array<i64: 1, 48, 1024>}]} {
    %c0 = arith.constant 0 : index
    %c0_0 = arith.constant 0 : index
    %c0_1 = arith.constant 0 : index
    %0 = vector.load %arg4[%c0, %c0_0, %c0_1] : memref<1x288x1024xf32, #tpu.memory_space<vmem>>, vector<1x288x1024xf32>
    %1 = vector.shape_cast %0 : vector<1x288x1024xf32> to vector<288x1024xf32>
    %c0_2 = arith.constant 0 : index
    %c0_3 = arith.constant 0 : index
    %c0_4 = arith.constant 0 : index
    %2 = vector.load %arg3[%c0_2, %c0_3, %c0_4] : memref<1x288x1xf32, #tpu.memory_space<vmem>>, vector<1x288x1xf32>
    %3 = vector.shape_cast %2 : vector<1x288x1xf32> to vector<288x1xf32>
    %4 = vector.broadcast %3 : vector<288x1xf32> to vector<288x1024xf32>
    %5 = arith.mulf %1, %4 : vector<288x1024xf32>
    %c0_5 = arith.constant 0 : index
    %c0_6 = arith.constant 0 : index
    %6 = vector.load %arg2[%c0_5, %c0_6] : memref<48x288xf32, #tpu.memory_space<vmem>>, vector<48x288xf32>
    %cst = arith.constant dense<0.000000e+00> : vector<48x1024xf32>
    %7 = tpu.matmul %6, %5, %cst {dimension_numbers = #tpu.dot_dimension_numbers<[1], [0], [0], [1], [0, 0, 1, 1], [], []>} : vector<48x288xf32>, vector<288x1024xf32>, vector<48x1024xf32> -> vector<48x1024xf32>
    %c0_7 = arith.constant 0 : index
    %c0_8 = arith.constant 0 : index
    %c0_9 = arith.constant 0 : index
    %8 = vector.load %arg5[%c0_7, %c0_8, %c0_9] : memref<1x48x1024xf32, #tpu.memory_space<vmem>>, vector<1x48x1024xf32>
    %9 = vector.shape_cast %8 : vector<1x48x1024xf32> to vector<48x1024xf32>
    %10 = vector.shape_cast %7 : vector<48x1024xf32> to vector<1x48x1024xf32>
    tpu.vector_store %arg5[%c0_7, %c0_8, %c0_9], %10 {strides = array<i32>} : memref<1x48x1024xf32, #tpu.memory_space<vmem>>, vector<1x48x1024xf32>,
    return
  }
  func.func @transform_0(%arg0: i32, %arg1: i32) -> (i32, i32) {
    %c0_i32 = arith.constant 0 : i32
    %c0_i32_0 = arith.constant 0 : i32
    %c0_i32_1 = arith.constant 0 : i32
    return %c0_i32, %c0_i32_0 : i32, i32
  }
  func.func @transform_1(%arg0: i32, %arg1: i32) -> (i32, i32, i32) {
    %c0_i32 = arith.constant 0 : i32
    %c0_i32_0 = arith.constant 0 : i32
    %c0_i32_1 = arith.constant 0 : i32
    return %arg0, %c0_i32, %c0_i32_0 : i32, i32, i32
  }
  func.func @transform_2(%arg0: i32, %arg1: i32) -> (i32, i32, i32) {
    %c0_i32 = arith.constant 0 : i32
    %c0_i32_0 = arith.constant 0 : i32
    return %arg0, %c0_i32, %arg1 : i32, i32, i32
  }
  func.func @transform_3(%arg0: i32, %arg1: i32) -> (i32, i32, i32) {
    %c0_i32 = arith.constant 0 : i32
    %c0_i32_0 = arith.constant 0 : i32
    return %arg0, %c0_i32, %arg1 : i32, i32, i32
  }
}

</mosaic_0001>

<bundles_post_ra>
// kernel: tpu_custom_call.1
= control target key start
LH: loop header
LB: loop body
LE: loop exit
PB: predicated region body
PF: predicated region fallthrough
CT: control target
= control target key end

     0   :  { %s3543_s0 = inlined_call_operand.hbm [shape: f32[48,288], index: 0, kind: input, shape index: {}]   ;;  %s3544_s1 = inlined_call_operand.vmem [shape: f32[1,288,1], index: 1, kind: input, shape index: {}]   ;;  %s3545_s2 = inlined_call_operand.hbm [shape: f32[1,288,1600], index: 2, kind: input, shape index: {}]   ;;  %s3546_s3 = inlined_call_operand.hbm [shape: f32[1,48,1600], index: 3, kind: output, shape index: {}]  }
   0x1   :  { %3563 = sst [smem:[#allocation19_spill]] %s3543_s0 }
   0x2   :  { %8 = vsyncpa [#allocation3], 0 }
   0x3   :  { %9 = vsyncpa [#allocation6], 0 }
   0x4   :  { %11 = vsyncpa [#allocation6 + $0x1], 0 }
   0x5   :  { %12 = vsyncpa [#allocation4], 0 }
   0x6   :  { %14 = vsyncpa [#allocation4 + $0x1], 0  ;;  %s2395_s12 = smov 0   ;;  %s2397_s13 = smov 0  }
   0x7   :  { %s2399_s14 = smov 0   ;;  %s2401_s15 = smov 0  }
   0x8   :  { %s2403_s16 = smov 0   ;;  %s2405_s17 = smov 0  }
   0x9 LB: > { %s2081_s18 = sadd.s32 4294967295, %s2362_s17   ;;  %s2082_s19 = sadd.s32 4294967294, %s2362_s17   ;;  %s2362_s17 = sphi %s2405_s17, %s20_s17   ;;  %s2358_s16 = sphi %s2403_s16, %s3595_s16   ;;  %s2354_s15 = sphi %s2401_s15, %s3594_s15   ;;  %s2350_s14 = sphi %s2399_s14, %s3593_s14   ;;  %s2346_s13 = sphi %s2397_s13, %s3592_s13   ;;  %s2342_s12 = sphi %s2395_s12, %s3591_s12  }
   0xa   : > { %s29_s20 = sadd.s32 1, %s2358_s16  ;;  %s88_s21 = sadd.s32 1, %s2350_s14 }
   0xb   : > { %p30_p0 = scmp.ge.s32.totalorder %s29_s20, 2  ;;  %p95_p1 = scmp.ne.s32.totalorder %s2350_s14, %s2346_s13 }
   0xc   : > { %p96_p2 = scmp.eq.s32.totalorder %s2362_s17, 0  ;;  %p101_p3 = scmp.ne.s32.totalorder %s2346_s13, %s2342_s12 }
   0xd   : > { %s3597_s20 = smov (%p30_p0, %s29_s20), 0  ;;  %p2440_p5 = scmp.eq.s32.totalorder %s2081_s18, 0 }
   0xe   : > { %p2436_p4 = por %p96_p2, %p95_p1  ;;  %s84_s24 = ssub.s32 %s2358_s16, %s3597_s20 }
   0xf   : > { %p127_p6 = scmp.eq.s32.totalorder %s2081_s18, 1  ;;  %p86_p7 = scmp.eq.s32.totalorder %s84_s24, 0 }
  0x10   : > { %p2448_p8 = por %p2440_p5, %p101_p3  ;;  %p133_p10 = scmp.eq.s32.totalorder %s2082_s19, 1 }
  0x11   : > { %p2452_p9 = por %p127_p6, %p95_p1  ;;  %p2083_p12 = scmp.ge.s32.totalorder %s2362_s17, 1 }
  0x12   : > { %s3566_s25 = scalar_select %p2448_p8, 1, 0 }
  0x13   : > { %s3567_s26 = scalar_select %p2452_p9, 1, 0 }
  0x14   : > { %s2457_s27 = scalar_select %p86_p7, %s2350_s14, %s88_s21  }
  0x15   : > { %p2459_p11 = por %p133_p10, %p101_p3  ;;  %p140_p13 = scmp.lt.s32.totalorder %s2362_s17, 3 }
  0x16   : > { %s2364_s30 = smov [#allocation2]  }
  0x17   : > { %s3568_s28 = scalar_select %p2459_p11, 1, 0 }
  0x18   : > { %p2465_p0 = pnand %p2083_p12, %p140_p13  ;;  %s152_s4 = sshll.u32 %s2364_s30, 4  ;;  %s153_s4 = int_to_ptr.vmem [resolvable:$true] %s152_s4 }
  0x19   : > { %s2237_s5 = scalar_lea.vmem %s153_s4, 2304  ;;  %p2245_p11 = scmp.lt.s32.totalorder %s153_s4, %s153_s4 }
  0x1a   : > { %p2138_p1 = pneg %p2465_p0  ;;  %p2238_p3 = scmp.ne.s32.totalorder %s153_s4, %s2237_s5 }
  0x1b   : > { %p2246_p9 = scmp.lt.s32.totalorder %s2237_s5, %s2237_s5 }
  0x1c   : > { %p2139_p2 = pnand %p2138_p1, %p2440_p5 }
  0x1d   : > { %p2247_p8 = por %p2246_p9, %p2245_p11 }
  0x1e   : > { %p2228_p6 = pneg %p2139_p2 }
  0x20   : > { %p2240_p7 = pnand %p2238_p3, %p2228_p6 }
  0x22   : > { %p2241_p10 = pneg %p2240_p7 }
  0x24   : > { %p2248_p12 = pnand %p2247_p8, %p2241_p10 }
  0x26   : > { %2251 = shalt.err (!%p2248_p12)
}
  0x27   : > { %s2365_s6 = smov 384   ;;  %s2366_s7 = smov 24  }
  0x28   : > { %s3570_s0 = sld [smem:[#allocation19_spill]]  ;;  %p2086_p13 = scmp.ge.s32.totalorder %s2362_s17, 2 }
  0x2a   : > { %170 = sbr.rel (%p2086_p13) target bundleno = 71 (0x47), region = 24 }
  0x2e   : > { %2141 = dma.hbm_to_vmem [thread:$0]  (!%p2139_p2), %s3570_s0, 2304, %s153_s4, [#allocation3], %s2365_s6, %s2365_s6, %s2366_s7  }
  0x2f   : > { %173 = sbr.rel (!%p2436_p4) target bundleno = 71 (0x47), region = 28  ;;  %s174_s10 = sand.u32 (%p2436_p4), 1, %s2350_s14  }
  0x30   : > { %s2087_s11 = sshll.u32 (%p2436_p4), %s2358_s16, 3  ;;  %s2129_s18 = smul.u32 (%p2436_p4), 2304, %s174_s10 }
  0x31   : > { %s180_s19 = ssub.s32 (%p2436_p4), 13, %s2087_s11  ;;  %s2489_s30 = scalar_lea.sflag (%p2436_p4), [#allocation6], %s174_s10 }
  0x32   : > { %p181_p8 = scmp.lt.s32.totalorder (%p2436_p4), %s180_s19, 8  ;;  %s178_s4 = scalar_lea.vmem (%p2436_p4), [#allocation5], %s2129_s18 }
  0x34   : > { %s3599_s19 = smov (!%p181_p8, %s180_s19), 8 }
  0x35   : > { %s2486_s21 = smul.u32 4608, %s3599_s19 }
  0x37   : > { %s185_s24 = ssub.s32 36864, %s2486_s21 }
  0x38   : > { %186 = vsyncadd %s2489_s30, %s185_s24  ;;  %p2088_p4 = scmp.ne.s32.totalorder %s2486_s21, 0  ;;  %s2127_s22 = sshll.u32 %s2358_s16, 10 }
  0x39   : > { %s191_s7 = scalar_lea.hbm %s3545_s2, %s2127_s22  ;;  %s2090_s8 = sshll.u32 %s3599_s19, 3 }
  0x3a   : > { %s194_s9 = sshll.u32 %s178_s4, 4  ;;  %s2367_s10 = smov [#allocation5]   ;;  %s195_s9 = int_to_ptr.vmem [resolvable:$true] %s194_s9 }
  0x3b   : > { %s2264_s11 = scalar_lea.vmem %s195_s9, %s2486_s21  ;;  %s2268_s18 = sshll.u32 %s2367_s10, 4  ;;  %s2269_s18 = int_to_ptr.vmem [resolvable:$false] %s2268_s18 }
  0x3c   : > { %p2265_p9 = scmp.ne.s32.totalorder %s195_s9, %s2264_s11  ;;  %s2270_s24 = scalar_lea.vmem %s2269_s18, 73728 }
  0x3d   : > { %p2271_p2 = scmp.lt.s32.totalorder %s195_s9, %s2269_s18  ;;  %p2272_p6 = scmp.lt.s32.totalorder %s2270_s24, %s2264_s11 }
  0x3e   : > { %p2266_p11 = pnand %p2265_p9, %p2088_p4 }
  0x3f   : > { %p2273_p3 = por %p2272_p6, %p2271_p2 }
  0x40   : > { %p2267_p1 = pneg %p2266_p11 }
  0x42   : > { %p2274_p7 = pnand %p2273_p3, %p2267_p1 }
  0x44   : > { %2277 = shalt.err (!%p2274_p7)
}
  0x45   : > { %s2368_s0 = smov 1664   ;;  %s2369_s19 = smov 1024  }
  0x46   : > { %200 = dma.hbm_to_vmem [thread:$0]  (%p2088_p4), %s191_s7, %s2486_s21, %s195_s9, %s2489_s30, %s2368_s0, %s2369_s19, %s2090_s8  }
  0x47 PF: > { %206 = sbr.rel (%p2465_p0) target bundleno = 653 (0x28d), region = 32 }
  0x4c   : > { %2329 = dma.done.wait (%p2440_p5), [#allocation3], 2304  }
  0x4d   : > { %2331 = vsyncadd (%p2440_p5), [#allocation3], 4294964992  ;;  %s2512_s4 = sand.u32 1, %s2346_s13   ;;  %p3571_p10 = scmp.ne.s32.totalorder %s3566_s25, 0 }
  0x4e   : > { %s2130_s22 = smul.u32 2304, %s2512_s4  ;;  %s213_s5 = scalar_lea.sflag [#allocation6], %s2512_s4 }
  0x50   : > { %s2516_s0 = scalar_lea.vmem [#allocation5], %s2130_s22 }
  0x51   : > { %2333 = dma.done.wait (%p3571_p10), %s213_s5, 36864  }
  0x52   : > { %2335 = vsyncadd (%p3571_p10), %s213_s5, 4294930432  ;;  %v2370_v0 = vmov 0   ;;  %v562_v1 = vld [vmem:[%s3544_s1 + $0x78] sm:$0xff]  ;;  %v560_v2 = vld [vmem:[%s3544_s1 + $0x68] sm:$0xff]  ;;  %v3548_v17 = vmov 0.0   ;;  %vm1069_vm0 = vcmask 261120  }
  0x53   : > { %2207 = vset.pattern.permute.xlu1 %v2370_v0  ;;  %2206 = vset.pattern.permute.xlu0 %v2370_v0  ;;  %v561_v3 = vld [vmem:[%s3544_s1 + $0x70] sm:$0xff]  ;;  %v559_v4 = vld [vmem:[%s3544_s1 + $0x60] sm:$0xff]  ;;  %v558_v5 = vld [vmem:[%s3544_s1 + $0x58] sm:$0xff]  ;;  %s1945_s11 = scalar_lea.sflag [#allocation4], %s2512_s4  ;;  %p3589_p5 = scmp.ne.s32.totalorder %s3567_s26, 0 }
  0x54   : > { %660 = vperm.xlu0 %2206, %v562_v1   ;;  %650 = vperm.xlu1 %2207, %v560_v2   ;;  %v557_v6 = vld [vmem:[%s3544_s1 + $0x50] sm:$0xff]  ;;  %v556_v7 = vld [vmem:[%s3544_s1 + $0x48] sm:$0xff]  ;;  %v555_v8 = vld [vmem:[%s3544_s1 + $0x40] sm:$0xff]  ;;  %s2119_s10 = sshll.u32 (%p3589_p5), %s2354_s15, 3 }
  0x55   : > { %v582_v9 = vld [vmem:[%s3544_s1 + $0x118] sm:$0xff]  ;;  %v581_v11 = vld [vmem:[%s3544_s1 + $0x110] sm:$0xff]  ;;  %v580_v13 = vld [vmem:[%s3544_s1 + $0x108] sm:$0xff]  ;;  %1253 = vmatprep.mubr.f32.mxu1 %v3548_v17  ;;  %s1953_s18 = ssub.s32 (%p3589_p5), 13, %s2119_s10 }
  0x56   : > { %v554_v10 = vld [vmem:[%s3544_s1 + $0x38] sm:$0xff]  ;;  %v553_v12 = vld [vmem:[%s3544_s1 + $0x30] sm:$0xff]  ;;  %v552_v14 = vld [vmem:[%s3544_s1 + $0x28] sm:$0xff]  ;;  %p1954_p0 = scmp.lt.s32.totalorder (%p3589_p5), %s1953_s18, 8 }
  0x57   : > { %v579_v15 = vld [vmem:[%s3544_s1 + $0x100] sm:$0xff]  ;;  %v550_v18 = vld [vmem:[%s3544_s1 + $0x18] sm:$0xff]  ;;  %v549_v19 = vld [vmem:[%s3544_s1 + $0x10] sm:$0xff] }
  0x58   : > { %655 = vperm.xlu0 %2206, %v561_v3   ;;  %645 = vperm.xlu1 %2207, %v559_v4   ;;  %v551_v16 = vld [vmem:[%s3544_s1 + $0x20] sm:$0xff]  ;;  %v548_v20 = vld [vmem:[%s3544_s1 + $0x8] sm:$0xff]  ;;  %v578_v22 = vld [vmem:[%s3544_s1 + $0xf8] sm:$0xff] }
  0x59   : > { %v547_v21 = vld [vmem:[%s3544_s1] sm:$0xff]  ;;  %v577_v23 = vld [vmem:[%s3544_s1 + $0xf0] sm:$0xff]  ;;  %v576_v24 = vld [vmem:[%s3544_s1 + $0xe8] sm:$0xff] }
  0x5a   : > { %v575_v25 = vld [vmem:[%s3544_s1 + $0xe0] sm:$0xff]  ;;  %v574_v26 = vld [vmem:[%s3544_s1 + $0xd8] sm:$0xff]  ;;  %v573_v27 = vld [vmem:[%s3544_s1 + $0xd0] sm:$0xff] }
  0x5b   : > { %v572_v28 = vld [vmem:[%s3544_s1 + $0xc8] sm:$0xff]  ;;  %v571_v29 = vld [vmem:[%s3544_s1 + $0xc0] sm:$0xff]  ;;  %v570_v30 = vld [vmem:[%s3544_s1 + $0xb8] sm:$0xff] }
  0x5c   : > { %640 = vperm.xlu0 %2206, %v558_v5   ;;  %635 = vperm.xlu1 %2207, %v557_v6   ;;  %v569_v31 = vld [vmem:[%s3544_s1 + $0xb0] sm:$0xff]  ;;  %v568_v32 = vld [vmem:[%s3544_s1 + $0xa8] sm:$0xff]  ;;  %v567_v33 = vld [vmem:[%s3544_s1 + $0xa0] sm:$0xff] }
  0x5d   : > { %v566_v34 = vld [vmem:[%s3544_s1 + $0x98] sm:$0xff]  ;;  %v565_v35 = vld [vmem:[%s3544_s1 + $0x90] sm:$0xff]  ;;  %v564_v36 = vld [vmem:[%s3544_s1 + $0x88] sm:$0xff] }
  0x5e   : > { %v563_v37 = vld [vmem:[%s3544_s1 + $0x80] sm:$0xff]  ;;  %v1052_v38 = vld [vmem:[#allocation2 + $0x8] sm:$0xff]  ;;  %v380_v39 = vld [vmem:[%s2516_s0 + $0x3c8] sm:$0xff] }
  0x5f   : > { %1152 = vmatprep.mubr.f32.mxu0 %v1052_v38  ;;  %v379_v40 = vld [vmem:[%s2516_s0 + $0x3c0] sm:$0xff]  ;;  %v372_v45 = vld [vmem:[%s2516_s0 + $0x388] sm:$0xff] }
  0x60   : > { %630 = vperm.xlu0 %2206, %v556_v7   ;;  %625 = vperm.xlu1 %2207, %v555_v8   ;;  %v371_v46 = vld [vmem:[%s2516_s0 + $0x380] sm:$0xff]  ;;  %v364_v49 = vld [vmem:[%s2516_s0 + $0x348] sm:$0xff] }
  0x61   : > { %v363_v52 = vld [vmem:[%s2516_s0 + $0x340] sm:$0xff]  ;;  %v356_v53 = vld [vmem:[%s2516_s0 + $0x308] sm:$0xff] }
  0x62   : > { %v355_v55 = vld [vmem:[%s2516_s0 + $0x300] sm:$0xff]  ;;  %v348_v59 = vld [vmem:[%s2516_s0 + $0x2c8] sm:$0xff] }
  0x63   : > { %v347_v61 = vld [vmem:[%s2516_s0 + $0x2c0] sm:$0xff]  ;;  %v340_v63 = vld [vmem:[%s2516_s0 + $0x288] sm:$0xff] }
  0x64   : > { %760 = vperm.xlu0 %2206, %v582_v9   ;;  %620 = vperm.xlu1 %2207, %v554_v10   ;;  %v339_v1 = vld [vmem:[%s2516_s0 + $0x280] sm:$0xff]  ;;  %v332_v5 = vld [vmem:[%s2516_s0 + $0x248] sm:$0xff] }
  0x65   : > { %v331_v7 = vld [vmem:[%s2516_s0 + $0x240] sm:$0xff]  ;;  %v324_v9 = vld [vmem:[%s2516_s0 + $0x208] sm:$0xff] }
  0x66   : > { %v540_v10 = vld [vmem:[%s2516_s0 + $0x8c8] sm:$0xff]  ;;  %v299_v38 = vld [vmem:[%s2516_s0 + $0x140] sm:$0xff] }
  0x68   : > { %755 = vperm.xlu0 %2206, %v581_v11   ;;  %615 = vperm.xlu1 %2207, %v553_v12   ;;  %v539_v11 = vld [vmem:[%s2516_s0 + $0x8c0] sm:$0xff] }
  0x6c   : > { %750 = vperm.xlu0 %2206, %v580_v13   ;;  %610 = vperm.xlu1 %2207, %v552_v14   ;;  %v323_v13 = vld [vmem:[%s2516_s0 + $0x200] sm:$0xff] }
  0x70   : > { %745 = vperm.xlu0 %2206, %v579_v15   ;;  %605 = vperm.xlu1 %2207, %v551_v16  }
  0x74   : > { %600 = vperm.xlu0 %2206, %v550_v18   ;;  %595 = vperm.xlu1 %2207, %v549_v19   ;;  %v316_v18 = vld [vmem:[%s2516_s0 + $0x1c8] sm:$0xff] }
  0x78   : > { %590 = vperm.xlu0 %2206, %v548_v20   ;;  %585 = vperm.xlu1 %2207, %v547_v21  }
  0x7c   : > { %740 = vperm.xlu0 %2206, %v578_v22   ;;  %735 = vperm.xlu1 %2207, %v577_v23   ;;  %v315_v22 = vld [vmem:[%s2516_s0 + $0x1c0] sm:$0xff]  ;;  %v308_v23 = vld [vmem:[%s2516_s0 + $0x188] sm:$0xff] }
  0x80   : > { %730 = vperm.xlu0 %2206, %v576_v24   ;;  %725 = vperm.xlu1 %2207, %v575_v25   ;;  %v532_v25 = vld [vmem:[%s2516_s0 + $0x888] sm:$0xff] }
  0x84   : > { %720 = vperm.xlu0 %2206, %v574_v26   ;;  %715 = vperm.xlu1 %2207, %v573_v27   ;;  %v307_v26 = vld [vmem:[%s2516_s0 + $0x180] sm:$0xff] }
  0x85   : > { %v531_v27 = vld [vmem:[%s2516_s0 + $0x880] sm:$0xff] }
  0x88   : > { %710 = vperm.xlu0 %2206, %v572_v28   ;;  %705 = vperm.xlu1 %2207, %v571_v29  }
  0x8c   : > { %700 = vperm.xlu0 %2206, %v570_v30   ;;  %695 = vperm.xlu1 %2207, %v569_v31  }
  0x90   : > { %690 = vperm.xlu0 %2206, %v568_v32   ;;  %685 = vperm.xlu1 %2207, %v567_v33  }
  0x94   : > { %680 = vperm.xlu0 %2206, %v566_v34   ;;  %675 = vperm.xlu1 %2207, %v565_v35  }
  0x98   : > { %670 = vperm.xlu0 %2206, %v564_v36   ;;  %665 = vperm.xlu1 %2207, %v563_v37   ;;  %v300_v36 = vld [vmem:[%s2516_s0 + $0x148] sm:$0xff] }
  0x99   : > { %v524_v37 = vld [vmem:[%s2516_s0 + $0x848] sm:$0xff] }
  0xcf   : > { %v2633_v41 = vpop.permute.xlu0 %660  ;;  %v2635_v42 = vpop.permute.xlu1 %650 }
  0xd0   : > { %v884_v43 = vmul.f32 %v2633_v41, %v380_v39  ;;  %v883_v44 = vmul.f32 %v2633_v41, %v379_v40  ;;  %v868_v54 = vmul.f32 %v2635_v42, %v364_v49  ;;  %v867_v58 = vmul.f32 %v2635_v42, %v363_v52  ;;  %v523_v39 = vld [vmem:[%s2516_s0 + $0x840] sm:$0xff] }
  0xd1   : > { %v291_v52 = vld [vmem:[%s2516_s0 + $0x100] sm:$0xff] }
  0xd2   : > { %1088 = vmatprep.subr.mxu0 %v884_v43 }
  0xd3   : > { %v2641_v47 = vpop.permute.xlu0 %655  ;;  %v2643_v48 = vpop.permute.xlu1 %645  ;;  %1089 = vmatpush1.msra.mxu0 %v883_v44 }
  0xd4   : > { %v876_v50 = vmul.f32 %v2641_v47, %v372_v45  ;;  %v875_v51 = vmul.f32 %v2641_v47, %v371_v46  ;;  %v860_v60 = vmul.f32 %v2643_v48, %v356_v53  ;;  %v859_v62 = vmul.f32 %v2643_v48, %v355_v55  ;;  %v515_v53 = vld [vmem:[%s2516_s0 + $0x800] sm:$0xff] }
  0xd6   : > { %1090 = vmatprep.subr.mxu0 %v876_v50  ;;  %v292_v50 = vld [vmem:[%s2516_s0 + $0x108] sm:$0xff] }
  0xd7   : > { %v2652_v56 = vpop.permute.xlu0 %640  ;;  %v2654_v57 = vpop.permute.xlu1 %635  ;;  %1091 = vmatpush1.msra.mxu0 %v875_v51  ;;  %v516_v51 = vld [vmem:[%s2516_s0 + $0x808] sm:$0xff] }
  0xd8   : > { %1092 = vmatprep.subr.mxu0 %v868_v54  ;;  %v852_v0 = vmul.f32 %v2652_v56, %v348_v59  ;;  %v851_v4 = vmul.f32 %v2652_v56, %v347_v61  ;;  %v844_v6 = vmul.f32 %v2654_v57, %v340_v63  ;;  %v843_v8 = vmul.f32 %v2654_v57, %v339_v1  ;;  %v381_v63 = vld [vmem:[%s2516_s0 + $0x3d0] sm:$0xff]  ;;  %v2730_v1 = vld [vmem:[#allocation2 + $0x10] sm:$0xff] }
  0xd9   : > { %1093 = vmatpush1.msra.mxu0 %v867_v58  ;;  %v382_v58 = vld [vmem:[%s2516_s0 + $0x3d8] sm:$0xff] }
  0xda   : > { %1094 = vmatprep.subr.mxu0 %v860_v60 }
  0xdb   : > { %v2664_v2 = vpop.permute.xlu0 %630  ;;  %v2666_v3 = vpop.permute.xlu1 %625  ;;  %1095 = vmatpush1.msra.mxu0 %v859_v62 }
  0xdc   : > { %1096 = vmatprep.subr.mxu0 %v852_v0  ;;  %v836_v12 = vmul.f32 %v2664_v2, %v332_v5  ;;  %v835_v16 = vmul.f32 %v2664_v2, %v331_v7  ;;  %v828_v19 = vmul.f32 %v2666_v3, %v324_v9  ;;  %v827_v24 = vmul.f32 %v2666_v3, %v323_v13  ;;  %v374_v0 = vld [vmem:[%s2516_s0 + $0x398] sm:$0xff]  ;;  %v283_v5 = vld [vmem:[%s2516_s0 + $0xc0] sm:$0xff]  ;;  %v373_v7 = vld [vmem:[%s2516_s0 + $0x390] sm:$0xff] }
  0xdd   : > { %1097 = vmatpush1.msra.mxu0 %v851_v4  ;;  %v284_v4 = vld [vmem:[%s2516_s0 + $0xc8] sm:$0xff] }
  0xde   : > { %1098 = vmatprep.subr.mxu0 %v844_v6  ;;  %v886_v6 = vmul.f32 %v2633_v41, %v382_v58 }
  0xdf   : > { %v2678_v14 = vpop.permute.xlu0 %760  ;;  %v2680_v15 = vpop.permute.xlu1 %620  ;;  %1099 = vmatpush1.msra.mxu0 %v843_v8 }
  0xe0   : > { %1100 = vmatprep.subr.mxu0 %v836_v12  ;;  %v1044_v20 = vmul.f32 %v2678_v14, %v540_v10  ;;  %v1043_v21 = vmul.f32 %v2678_v14, %v539_v11  ;;  %v820_v28 = vmul.f32 %v2680_v15, %v316_v18  ;;  %v819_v31 = vmul.f32 %v2680_v15, %v315_v22  ;;  %v276_v11 = vld [vmem:[%s2516_s0 + $0x88] sm:$0xff]  ;;  %v366_v12 = vld [vmem:[%s2516_s0 + $0x358] sm:$0xff] }
  0xe1   : > { %1101 = vmatpush1.msra.mxu0 %v835_v16  ;;  %v885_v10 = vmul.f32 %v2633_v41, %v381_v63  ;;  %v878_v16 = vmul.f32 %v2641_v47, %v374_v0  ;;  %v268_v22 = vld [vmem:[%s2516_s0 + $0x48] sm:$0xff]  ;;  %v334_v63 = vld [vmem:[%s2516_s0 + $0x258] sm:$0xff] }
  0xe2   : > { %1102 = vmatprep.subr.mxu0 %v828_v19  ;;  %1213 = vmatprep.subr.mxu1 %v1044_v20  ;;  %v275_v19 = vld [vmem:[%s2516_s0 + $0x80] sm:$0xff]  ;;  %v365_v20 = vld [vmem:[%s2516_s0 + $0x350] sm:$0xff] }
  0xe3   : > { %v2694_v29 = vpop.permute.xlu0 %755  ;;  %v2696_v30 = vpop.permute.xlu1 %615  ;;  %1103 = vmatpush1.msra.mxu0 %v827_v24  ;;  %1214 = vmatpush1.msra.mxu1 %v1043_v21  ;;  %v877_v21 = vmul.f32 %v2641_v47, %v373_v7  ;;  %v267_v24 = vld [vmem:[%s2516_s0 + $0x40] sm:$0xff]  ;;  %v333_v7 = vld [vmem:[%s2516_s0 + $0x250] sm:$0xff] }
  0xe4   : > { %1104 = vmatprep.subr.mxu0 %v820_v28  ;;  %v812_v32 = vmul.f32 %v2696_v30, %v308_v23  ;;  %v1036_v33 = vmul.f32 %v2694_v29, %v532_v25  ;;  %v811_v34 = vmul.f32 %v2696_v30, %v307_v26  ;;  %v1035_v35 = vmul.f32 %v2694_v29, %v531_v27  ;;  %v358_v23 = vld [vmem:[%s2516_s0 + $0x318] sm:$0xff]  ;;  %v357_v27 = vld [vmem:[%s2516_s0 + $0x310] sm:$0xff] }
  0xe5   : > { %1105 = vmatpush1.msra.mxu0 %v819_v31  ;;  %v870_v26 = vmul.f32 %v2635_v42, %v366_v12  ;;  %v326_v12 = vld [vmem:[%s2516_s0 + $0x218] sm:$0xff] }
  0xe6   : > { %1106 = vmatprep.subr.mxu0 %v812_v32  ;;  %1215 = vmatprep.subr.mxu1 %v1036_v33  ;;  %v869_v33 = vmul.f32 %v2635_v42, %v365_v20 }
  0xe7   : > { %v2707_v40 = vpop.permute.xlu0 %750  ;;  %v2709_v43 = vpop.permute.xlu1 %610  ;;  %1107 = vmatpush1.msra.mxu0 %v811_v34  ;;  %1216 = vmatpush1.msra.mxu1 %v1035_v35  ;;  %v260_v34 = vld [vmem:[%s2516_s0 + $0x8] sm:$0xff]  ;;  %v350_v35 = vld [vmem:[%s2516_s0 + $0x2d8] sm:$0xff] }
  0xe8   : > { %v804_v44 = vmul.f32 %v2709_v43, %v300_v36  ;;  %v1028_v45 = vmul.f32 %v2707_v40, %v524_v37  ;;  %v803_v46 = vmul.f32 %v2709_v43, %v299_v38  ;;  %v1027_v49 = vmul.f32 %v2707_v40, %v523_v39  ;;  %v259_v39 = vld [vmem:[%s2516_s0] sm:$0xff] }
  0xe9   : > { %v862_v37 = vmul.f32 %v2643_v48, %v358_v23  ;;  %v837_v23 = vmul.f32 %v2664_v2, %v333_v7  ;;  %v459_v7 = vld [vmem:[%s2516_s0 + $0x640] sm:$0xff] }
  0xea   : > { %1108 = vmatprep.subr.mxu0 %v804_v44  ;;  %1217 = vmatprep.subr.mxu1 %v1028_v45  ;;  %v349_v44 = vld [vmem:[%s2516_s0 + $0x2d0] sm:$0xff]  ;;  %v861_v45 = vmul.f32 %v2643_v48, %v357_v27  ;;  %v830_v27 = vmul.f32 %v2666_v3, %v326_v12 }
  0xeb   : > { %v2719_v54 = vpop.permute.xlu0 %745  ;;  %v2721_v55 = vpop.permute.xlu1 %605  ;;  %1109 = vmatpush1.msra.mxu0 %v803_v46  ;;  %1218 = vmatpush1.msra.mxu1 %v1027_v49  ;;  %v508_v46 = vld [vmem:[%s2516_s0 + $0x7c8] sm:$0xff]  ;;  %v342_v49 = vld [vmem:[%s2516_s0 + $0x298] sm:$0xff]  ;;  %v293_v12 = vld [vmem:[%s2516_s0 + $0x110] sm:$0xff] }
  0xec   : > { %v796_v59 = vmul.f32 %v2721_v55, %v292_v50  ;;  %v1020_v60 = vmul.f32 %v2719_v54, %v516_v51  ;;  %v795_v61 = vmul.f32 %v2721_v55, %v291_v52  ;;  %v1019_v62 = vmul.f32 %v2719_v54, %v515_v53  ;;  %v507_v50 = vld [vmem:[%s2516_s0 + $0x7c0] sm:$0xff]  ;;  %v341_v53 = vld [vmem:[%s2516_s0 + $0x290] sm:$0xff] }
  0xed   : > { %v854_v52 = vmul.f32 %v2652_v56, %v350_v35 }
  0xee   : > { %1110 = vmatprep.subr.mxu0 %v796_v59  ;;  %1219 = vmatprep.subr.mxu1 %v1020_v60 }
  0xef   : > { %v2736_v8 = vpop.permute.xlu0 %600  ;;  %v2738_v9 = vpop.permute.xlu1 %595  ;;  %1111 = vmatpush1.msra.mxu0 %v795_v61  ;;  %1220 = vmatpush1.msra.mxu1 %v1019_v62  ;;  %v853_v61 = vmul.f32 %v2652_v56, %v349_v44  ;;  %v500_v62 = vld [vmem:[%s2516_s0 + $0x788] sm:$0xff] }
  0xf0   : > { %2095 = vmatmul.mubr.msk.f32.vlgmr.msra.gmra.mxu1 %vm1069_vm0, %v2730_v1  ;;  %1290 = vmatprep.subr.mxu1 %v886_v6  ;;  %v788_v13 = vmul.f32 %v2736_v8, %v284_v4  ;;  %v787_v18 = vmul.f32 %v2736_v8, %v283_v5  ;;  %v780_v25 = vmul.f32 %v2738_v9, %v276_v11  ;;  %v499_v6 = vld [vmem:[%s2516_s0 + $0x780] sm:$0xff]  ;;  %v492_v11 = vld [vmem:[%s2516_s0 + $0x748] sm:$0xff] }
  0xf1   : > { %1291 = vmatpush1.msra.mxu1 %v885_v10  ;;  %v779_v32 = vmul.f32 %v2738_v9, %v275_v19  ;;  %v846_v4 = vmul.f32 %v2654_v57, %v342_v49  ;;  %v845_v10 = vmul.f32 %v2654_v57, %v341_v53  ;;  %v325_v19 = vld [vmem:[%s2516_s0 + $0x210] sm:$0xff]  ;;  %v302_v53 = vld [vmem:[%s2516_s0 + $0x158] sm:$0xff]  ;;  %1259 = vmatprep.mubr.f32.mxu1 %v3548_v17 }
  0xf2   : > { %1112 = vmatprep.subr.mxu0 %v788_v13  ;;  %1292 = vmatprep.subr.mxu1 %v878_v16  ;;  %v491_v13 = vld [vmem:[%s2516_s0 + $0x740] sm:$0xff]  ;;  %v829_v35 = vmul.f32 %v2666_v3, %v325_v19 }
  0xf3   : > { %v2757_v28 = vpop.permute.xlu0 %590  ;;  %v2759_v31 = vpop.permute.xlu1 %585  ;;  %1113 = vmatpush1.msra.mxu0 %v787_v18  ;;  %1293 = vmatpush1.msra.mxu1 %v877_v21  ;;  %v838_v18 = vmul.f32 %v2664_v2, %v334_v63  ;;  %v467_v63 = vld [vmem:[%s2516_s0 + $0x680] sm:$0xff] }
  0xf4   : > { %1114 = vmatprep.subr.mxu0 %v780_v25  ;;  %1294 = vmatprep.subr.mxu1 %v870_v26  ;;  %v772_v36 = vmul.f32 %v2757_v28, %v268_v22  ;;  %v771_v38 = vmul.f32 %v2757_v28, %v267_v24  ;;  %v764_v51 = vmul.f32 %v2759_v31, %v260_v34  ;;  %v484_v24 = vld [vmem:[%s2516_s0 + $0x708] sm:$0xff]  ;;  %v318_v25 = vld [vmem:[%s2516_s0 + $0x1d8] sm:$0xff]  ;;  %v317_v34 = vld [vmem:[%s2516_s0 + $0x1d0] sm:$0xff] }
  0xf5   : > { %1115 = vmatpush1.msra.mxu0 %v779_v32  ;;  %1295 = vmatpush1.msra.mxu1 %v869_v33  ;;  %v763_v60 = vmul.f32 %v2759_v31, %v259_v39  ;;  %v483_v33 = vld [vmem:[%s2516_s0 + $0x700] sm:$0xff]  ;;  %v822_v44 = vmul.f32 %v2680_v15, %v318_v25 }
  0xf6   : > { %1116 = vmatprep.subr.mxu0 %v772_v36  ;;  %1296 = vmatprep.subr.mxu1 %v862_v37  ;;  %v476_v36 = vld [vmem:[%s2516_s0 + $0x6c8] sm:$0xff]  ;;  %v310_v37 = vld [vmem:[%s2516_s0 + $0x198] sm:$0xff] }
  0xf7   : > { %v2777_v58 = vpop.permute.xlu0 %740  ;;  %v2779_v59 = vpop.permute.xlu1 %735  ;;  %1117 = vmatpush1.msra.mxu0 %v771_v38  ;;  %1297 = vmatpush1.msra.mxu1 %v861_v45  ;;  %v475_v38 = vld [vmem:[%s2516_s0 + $0x6c0] sm:$0xff]  ;;  %v309_v45 = vld [vmem:[%s2516_s0 + $0x190] sm:$0xff] }
  0xf8   : > { %1118 = vmatprep.subr.mxu0 %v764_v51  ;;  %1298 = vmatprep.subr.mxu1 %v854_v52  ;;  %v1012_v0 = vmul.f32 %v2777_v58, %v508_v46  ;;  %v1011_v5 = vmul.f32 %v2777_v58, %v507_v50  ;;  %v1004_v16 = vmul.f32 %v2779_v59, %v500_v62  ;;  %v468_v52 = vld [vmem:[%s2516_s0 + $0x688] sm:$0xff] }
  0xf9   : > { %1119 = vmatpush1.msra.mxu0 %v763_v60  ;;  %1299 = vmatpush1.msra.mxu1 %v853_v61  ;;  %v1003_v22 = vmul.f32 %v2779_v59, %v499_v6  ;;  %v821_v51 = vmul.f32 %v2680_v15, %v317_v34  ;;  %v814_v61 = vmul.f32 %v2696_v30, %v310_v37  ;;  %v294_v6 = vld [vmem:[%s2516_s0 + $0x118] sm:$0xff]  ;;  %v444_v34 = vld [vmem:[%s2516_s0 + $0x5c8] sm:$0xff] }
  0xfa   : > { %1120 = vmatprep.subr.mxu0 %v1012_v0  ;;  %1300 = vmatprep.subr.mxu1 %v846_v4  ;;  %v301_v0 = vld [vmem:[%s2516_s0 + $0x150] sm:$0xff]  ;;  %v813_v4 = vmul.f32 %v2696_v30, %v309_v45  ;;  %v798_v25 = vmul.f32 %v2721_v55, %v294_v6  ;;  %v262_v6 = vld [vmem:[%s2516_s0 + $0x18] sm:$0xff] }
  0xfb   : > { %v2797_v20 = vpop.permute.xlu0 %730  ;;  %v2799_v21 = vpop.permute.xlu1 %725  ;;  %1121 = vmatpush2.msra.mxu0 %v1011_v5  ;;  %1301 = vmatpush1.msra.mxu1 %v845_v10  ;;  %v460_v5 = vld [vmem:[%s2516_s0 + $0x648] sm:$0xff]  ;;  %v805_v19 = vmul.f32 %v2709_v43, %v301_v0  ;;  %v269_v0 = vld [vmem:[%s2516_s0 + $0x50] sm:$0xff] }
  0xfc   : > { %1122 = vmatprep.subr.mxu0 %v1004_v16  ;;  %1302 = vmatprep.subr.mxu1 %v838_v18  ;;  %v996_v26 = vmul.f32 %v2797_v20, %v492_v11  ;;  %v995_v32 = vmul.f32 %v2797_v20, %v491_v13  ;;  %v988_v39 = vmul.f32 %v2799_v21, %v484_v24 }
  0xfd   : > { %1123 = vmatpush2.msra.mxu0 %v1003_v22  ;;  %1303 = vmatpush1.msra.mxu1 %v837_v23  ;;  %v987_v50 = vmul.f32 %v2799_v21, %v483_v33  ;;  %v806_v11 = vmul.f32 %v2709_v43, %v302_v53  ;;  %v452_v22 = vld [vmem:[%s2516_s0 + $0x608] sm:$0xff]  ;;  %v286_v23 = vld [vmem:[%s2516_s0 + $0xd8] sm:$0xff]  ;;  %v797_v33 = vmul.f32 %v2721_v55, %v293_v12  ;;  %v261_v12 = vld [vmem:[%s2516_s0 + $0x10] sm:$0xff] }
  0xfe   : > { %1124 = vmatprep.subr.mxu0 %v996_v26  ;;  %1304 = vmatprep.subr.mxu1 %v830_v27  ;;  %v451_v27 = vld [vmem:[%s2516_s0 + $0x600] sm:$0xff]  ;;  %v270_v53 = vld [vmem:[%s2516_s0 + $0x58] sm:$0xff] }
  0xff   : > { %v2817_v46 = vpop.permute.xlu0 %720  ;;  %v2819_v49 = vpop.permute.xlu1 %715  ;;  %1125 = vmatpush2.msra.mxu0 %v995_v32  ;;  %1305 = vmatpush1.msra.mxu1 %v829_v35  ;;  %v285_v32 = vld [vmem:[%s2516_s0 + $0xd0] sm:$0xff]  ;;  %v278_v35 = vld [vmem:[%s2516_s0 + $0x98] sm:$0xff] }
 0x100   : > { %1126 = vmatprep.subr.mxu0 %v988_v39  ;;  %1306 = vmatprep.subr.mxu1 %v822_v44  ;;  %v980_v60 = vmul.f32 %v2817_v46, %v476_v36  ;;  %v979_v62 = vmul.f32 %v2817_v46, %v475_v38  ;;  %v972_v10 = vmul.f32 %v2819_v49, %v468_v52  ;;  %v443_v36 = vld [vmem:[%s2516_s0 + $0x5c0] sm:$0xff]  ;;  %v277_v39 = vld [vmem:[%s2516_s0 + $0x90] sm:$0xff]  ;;  %v436_v52 = vld [vmem:[%s2516_s0 + $0x588] sm:$0xff] }
 0x101   : > { %1127 = vmatpush2.msra.mxu0 %v987_v50  ;;  %1307 = vmatpush1.msra.mxu1 %v821_v51  ;;  %v971_v18 = vmul.f32 %v2819_v49, %v467_v63  ;;  %v790_v38 = vmul.f32 %v2736_v8, %v286_v23  ;;  %v789_v51 = vmul.f32 %v2736_v8, %v285_v32  ;;  %v435_v63 = vld [vmem:[%s2516_s0 + $0x580] sm:$0xff] }
 0x102   : > { %1128 = vmatprep.subr.mxu0 %v980_v60  ;;  %1308 = vmatprep.subr.mxu1 %v814_v61  ;;  %v782_v61 = vmul.f32 %v2738_v9, %v278_v35  ;;  %v773_v23 = vmul.f32 %v2757_v28, %v269_v0  ;;  %v765_v35 = vmul.f32 %v2759_v31, %v261_v12  ;;  %v486_v12 = vld [vmem:[%s2516_s0 + $0x718] sm:$0xff] }
 0x103   : > { %v2837_v13 = vpop.permute.xlu0 %710  ;;  %v2839_v16 = vpop.permute.xlu1 %705  ;;  %1129 = vmatpush2.msra.mxu0 %v979_v62  ;;  %1309 = vmatpush1.msra.mxu1 %v813_v4  ;;  %v781_v4 = vmul.f32 %v2738_v9, %v277_v39 }
 0x104   : > { %1130 = vmatprep.subr.mxu0 %v972_v10  ;;  %1310 = vmatprep.subr.mxu1 %v806_v11  ;;  %v964_v24 = vmul.f32 %v2837_v13, %v460_v5  ;;  %v963_v26 = vmul.f32 %v2837_v13, %v459_v7  ;;  %v956_v37 = vmul.f32 %v2839_v16, %v452_v22  ;;  %v428_v5 = vld [vmem:[%s2516_s0 + $0x548] sm:$0xff]  ;;  %v427_v7 = vld [vmem:[%s2516_s0 + $0x540] sm:$0xff] }
 0x105   : > { %1131 = vmatpush2.msra.mxu0 %v971_v18  ;;  %1311 = vmatpush1.msra.mxu1 %v805_v19  ;;  %v955_v50 = vmul.f32 %v2839_v16, %v451_v27  ;;  %v774_v11 = vmul.f32 %v2757_v28, %v270_v53  ;;  %v766_v27 = vmul.f32 %v2759_v31, %v262_v6  ;;  %v403_v6 = vld [vmem:[%s2516_s0 + $0x480] sm:$0xff] }
 0x106   : > { %1132 = vmatprep.subr.mxu0 %v964_v24  ;;  %1312 = vmatprep.subr.mxu1 %v798_v25  ;;  %v420_v24 = vld [vmem:[%s2516_s0 + $0x508] sm:$0xff]  ;;  %v510_v25 = vld [vmem:[%s2516_s0 + $0x7d8] sm:$0xff] }
 0x107   : > { %v2857_v44 = vpop.permute.xlu0 %700  ;;  %v2859_v45 = vpop.permute.xlu1 %695  ;;  %1133 = vmatpush2.msra.mxu0 %v963_v26  ;;  %1313 = vmatpush1.msra.mxu1 %v797_v33  ;;  %v419_v33 = vld [vmem:[%s2516_s0 + $0x500] sm:$0xff] }
 0x108   : > { %1134 = vmatprep.subr.mxu0 %v956_v37  ;;  %1314 = vmatprep.subr.mxu1 %v790_v38  ;;  %v948_v60 = vmul.f32 %v2857_v44, %v444_v34  ;;  %v947_v62 = vmul.f32 %v2857_v44, %v443_v36  ;;  %v940_v10 = vmul.f32 %v2859_v45, %v436_v52  ;;  %v509_v34 = vld [vmem:[%s2516_s0 + $0x7d0] sm:$0xff]  ;;  %v412_v36 = vld [vmem:[%s2516_s0 + $0x4c8] sm:$0xff]  ;;  %v502_v37 = vld [vmem:[%s2516_s0 + $0x798] sm:$0xff] }
 0x109   : > { %1135 = vmatpush2.msra.mxu0 %v955_v50  ;;  %1315 = vmatpush1.msra.mxu1 %v789_v51  ;;  %v939_v22 = vmul.f32 %v2859_v45, %v435_v63  ;;  %v411_v38 = vld [vmem:[%s2516_s0 + $0x4c0] sm:$0xff]  ;;  %v1014_v50 = vmul.f32 %v2777_v58, %v510_v25  ;;  %v501_v51 = vld [vmem:[%s2516_s0 + $0x790] sm:$0xff]  ;;  %v494_v63 = vld [vmem:[%s2516_s0 + $0x758] sm:$0xff] }
 0x10a   : > { %1136 = vmatprep.subr.mxu0 %v948_v60  ;;  %1316 = vmatprep.subr.mxu1 %v782_v61  ;;  %v1013_v61 = vmul.f32 %v2777_v58, %v509_v34  ;;  %v485_v25 = vld [vmem:[%s2516_s0 + $0x710] sm:$0xff]  ;;  %v388_v34 = vld [vmem:[%s2516_s0 + $0x408] sm:$0xff] }
 0x10b   : > { %v2877_v18 = vpop.permute.xlu0 %690  ;;  %v2879_v19 = vpop.permute.xlu1 %685  ;;  %1137 = vmatpush2.msra.mxu0 %v947_v62  ;;  %1317 = vmatpush1.msra.mxu1 %v781_v4  ;;  %v404_v62 = vld [vmem:[%s2516_s0 + $0x488] sm:$0xff]  ;;  %v1006_v4 = vmul.f32 %v2779_v59, %v502_v37  ;;  %v990_v37 = vmul.f32 %v2799_v21, %v486_v12 }
 0x10c   : > { %3572 = vst [vmem:[#allocation11_spill] sm:$0xff] %v2879_v19  ;;  %1138 = vmatprep.subr.mxu0 %v940_v10  ;;  %1318 = vmatprep.subr.mxu1 %v774_v11  ;;  %v932_v26 = vmul.f32 %v2877_v18, %v428_v5  ;;  %v931_v32 = vmul.f32 %v2877_v18, %v427_v7  ;;  %v493_v7 = vld [vmem:[%s2516_s0 + $0x750] sm:$0xff]  ;;  %v396_v11 = vld [vmem:[%s2516_s0 + $0x448] sm:$0xff] }
 0x10d   : > { %1139 = vmatpush2.msra.mxu0 %v939_v22  ;;  %1319 = vmatpush1.msra.mxu1 %v773_v23  ;;  %v924_v39 = vmul.f32 %v2879_v19, %v420_v24  ;;  %v923_v60 = vmul.f32 %v2879_v19, %v419_v33  ;;  %v1005_v10 = vmul.f32 %v2779_v59, %v501_v51  ;;  %v395_v22 = vld [vmem:[%s2516_s0 + $0x440] sm:$0xff] }
 0x10e   : > { %1140 = vmatprep.subr.mxu0 %v932_v26  ;;  %1320 = vmatprep.subr.mxu1 %v766_v27  ;;  %v998_v24 = vmul.f32 %v2797_v20, %v494_v63  ;;  %v997_v33 = vmul.f32 %v2797_v20, %v493_v7  ;;  %v989_v51 = vmul.f32 %v2799_v21, %v485_v25  ;;  %v542_v63 = vld [vmem:[%s2516_s0 + $0x8d8] sm:$0xff]  ;;  %v541_v7 = vld [vmem:[%s2516_s0 + $0x8d0] sm:$0xff] }
 0x10f   : > { %v2897_v52 = vpop.permute.xlu0 %680  ;;  %v2899_v53 = vpop.permute.xlu1 %675  ;;  %1141 = vmatpush2.msra.mxu0 %v931_v32  ;;  %1321 = vmatpush1.msra.mxu1 %v765_v35  ;;  %v478_v35 = vld [vmem:[%s2516_s0 + $0x6d8] sm:$0xff]  ;;  %v1046_v12 = vmul.f32 %v2678_v14, %v542_v63 }
 0x110   : > { %3573 = vst [vmem:[#allocation12_spill] sm:$0xff] %v2897_v52  ;;  %3574 = vst [vmem:[#allocation13_spill] sm:$0xff] %v2899_v53  ;;  %1142 = vmatprep.subr.mxu0 %v924_v39  ;;  %1322 = vmatprep.subr.mxu1 %v1014_v50  ;;  %v916_v0 = vmul.f32 %v2897_v52, %v412_v36  ;;  %v915_v5 = vmul.f32 %v2897_v52, %v411_v38  ;;  %v387_v39 = vld [vmem:[%s2516_s0 + $0x400] sm:$0xff]  ;;  %v477_v50 = vld [vmem:[%s2516_s0 + $0x6d0] sm:$0xff] }
 0x111   : > { %1143 = vmatpush2.msra.mxu0 %v923_v60  ;;  %1323 = vmatpush2.msra.mxu1 %v1013_v61  ;;  %v908_v23 = vmul.f32 %v2899_v53, %v404_v62  ;;  %v907_v32 = vmul.f32 %v2899_v53, %v403_v6  ;;  %v470_v60 = vld [vmem:[%s2516_s0 + $0x698] sm:$0xff]  ;;  %v982_v62 = vmul.f32 %v2817_v46, %v478_v35  ;;  %v469_v6 = vld [vmem:[%s2516_s0 + $0x690] sm:$0xff] }
 0x112   : > { %1144 = vmatprep.subr.mxu0 %v916_v0  ;;  %1324 = vmatprep.subr.mxu1 %v1006_v4  ;;  %v981_v4 = vmul.f32 %v2817_v46, %v477_v50  ;;  %v2948_v25 = vld [vmem:[#allocation2 + $0x28] sm:$0xff]  ;;  %v2954_v35 = vld [vmem:[#allocation2 + $0x20] sm:$0xff] }
 0x113   : > { %v2917_v26 = vpop.permute.xlu0 %670  ;;  %v2919_v27 = vpop.permute.xlu1 %665  ;;  %1145 = vmatpush2.msra.mxu0 %v915_v5  ;;  %1325 = vmatpush2.msra.mxu1 %v1005_v10  ;;  %v2937_v5 = vld [vmem:[#allocation2] sm:$0xff]  ;;  %v974_v10 = vmul.f32 %v2819_v49, %v470_v60  ;;  %v446_v63 = vld [vmem:[%s2516_s0 + $0x5d8] sm:$0xff] }
 0x114   : > { %3575 = vst [vmem:[#allocation14_spill] sm:$0xff] %v2917_v26  ;;  %3576 = vst [vmem:[#allocation15_spill] sm:$0xff] %v2919_v27  ;;  %1146 = vmatprep.subr.mxu0 %v908_v23  ;;  %1326 = vmatprep.subr.mxu1 %v998_v24  ;;  %v900_v36 = vmul.f32 %v2917_v26, %v396_v11  ;;  %v899_v38 = vmul.f32 %v2917_v26, %v395_v22  ;;  %v462_v11 = vld [vmem:[%s2516_s0 + $0x658] sm:$0xff]  ;;  %v453_v60 = vld [vmem:[%s2516_s0 + $0x610] sm:$0xff] }
 0x115   : > { %1147 = vmatpush2.msra.mxu0 %v907_v32  ;;  %1327 = vmatpush2.msra.mxu1 %v997_v33  ;;  %v892_v61 = vmul.f32 %v2919_v27, %v388_v34  ;;  %v891_v0 = vmul.f32 %v2919_v27, %v387_v39  ;;  %v534_v22 = vld [vmem:[%s2516_s0 + $0x898] sm:$0xff]  ;;  %v973_v23 = vmul.f32 %v2819_v49, %v469_v6  ;;  %v461_v32 = vld [vmem:[%s2516_s0 + $0x650] sm:$0xff] }
 0x116   : > { %1148 = vmatprep.subr.mxu0 %v900_v36  ;;  %1328 = vmatprep.subr.mxu1 %v990_v37  ;;  %v1045_v24 = vmul.f32 %v2678_v14, %v541_v7  ;;  %v533_v33 = vld [vmem:[%s2516_s0 + $0x890] sm:$0xff]  ;;  %v966_v34 = vmul.f32 %v2837_v13, %v462_v11  ;;  %v454_v36 = vld [vmem:[%s2516_s0 + $0x618] sm:$0xff]  ;;  %v1038_v37 = vmul.f32 %v2694_v29, %v534_v22 }
 0x117   : > { %1149 = vmatpush2.msra.mxu0 %v899_v38  ;;  %1329 = vmatpush2.msra.mxu1 %v989_v51  ;;  %v526_v38 = vld [vmem:[%s2516_s0 + $0x858] sm:$0xff]  ;;  %v965_v39 = vmul.f32 %v2837_v13, %v461_v32  ;;  %v1037_v50 = vmul.f32 %v2694_v29, %v533_v33  ;;  %v2963_v51 = vld [vmem:[#allocation2 + $0x18] sm:$0xff]  ;;  %v957_v6 = vmul.f32 %v2839_v16, %v453_v60  ;;  %v445_v11 = vld [vmem:[%s2516_s0 + $0x5d0] sm:$0xff] }
 0x118   : > { %1150 = vmatprep.subr.mxu0 %v892_v61  ;;  %1330 = vmatprep.subr.mxu1 %v982_v62  ;;  %v525_v61 = vld [vmem:[%s2516_s0 + $0x850] sm:$0xff]  ;;  %v958_v62 = vmul.f32 %v2839_v16, %v454_v36  ;;  %v950_v22 = vmul.f32 %v2857_v44, %v446_v63  ;;  %v544_v33 = vld [vmem:[%s2516_s0 + $0x8e8] sm:$0xff] }
 0x119   : > { %1151 = vmatpush2.msra.mxu0 %v891_v0  ;;  %1331 = vmatpush2.msra.mxu1 %v981_v4  ;;  %v1030_v0 = vmul.f32 %v2707_v40, %v526_v38  ;;  %v518_v4 = vld [vmem:[%s2516_s0 + $0x818] sm:$0xff]  ;;  %v1029_v7 = vmul.f32 %v2707_v40, %v525_v61  ;;  %v437_v38 = vld [vmem:[%s2516_s0 + $0x590] sm:$0xff]  ;;  %v1048_v60 = vmul.f32 %v2678_v14, %v544_v33  ;;  %v2997_v61 = vld [vmem:[#allocation2 + $0x50] sm:$0xff] }
 0x11a   : > { %1153 = vmatmul.mubr.f32.vlgmr.msra.gmra.mxu0 %v2937_v5  ;;  %1332 = vmatprep.subr.mxu1 %v974_v10  ;;  %v2975_v10 = vld [vmem:[#allocation2 + $0x40] sm:$0xff]  ;;  %v1022_v32 = vmul.f32 %v2719_v54, %v518_v4  ;;  %v941_v63 = vmul.f32 %v2859_v45, %v437_v38  ;;  %v422_v4 = vld [vmem:[%s2516_s0 + $0x518] sm:$0xff] }
 0x11b   : > { %1415 = vmatprep.subr.mxu0 %v1046_v12  ;;  %1333 = vmatpush2.msra.mxu1 %v973_v23  ;;  %v517_v12 = vld [vmem:[%s2516_s0 + $0x810] sm:$0xff]  ;;  %v2981_v23 = vld [vmem:[#allocation2 + $0x38] sm:$0xff]  ;;  %v406_v38 = vld [vmem:[%s2516_s0 + $0x498] sm:$0xff] }
 0x11c   : > { %1416 = vmatpush1.msra.mxu0 %v1045_v24  ;;  %2096 = vmatmul.mubr.msk.f32.gmra.mxu1 %vm1069_vm0, %v2948_v25  ;;  %v438_v24 = vld [vmem:[%s2516_s0 + $0x598] sm:$0xff]  ;;  %v1021_v36 = vmul.f32 %v2719_v54, %v517_v12  ;;  %v413_v33 = vld [vmem:[%s2516_s0 + $0x4d0] sm:$0xff] }
 0x11d   : > { %1334 = vmatprep.subr.mxu1 %v966_v34  ;;  %1417 = vmatprep.subr.mxu0 %v1038_v37  ;;  %v949_v34 = vmul.f32 %v2857_v44, %v445_v11  ;;  %v2990_v37 = vld [vmem:[#allocation2 + $0x30] sm:$0xff]  ;;  %v421_v11 = vld [vmem:[%s2516_s0 + $0x510] sm:$0xff] }
 0x11e   : > { %1158 = vmatprep.mubr.f32.mxu0 %v2954_v35  ;;  %1335 = vmatpush2.msra.mxu1 %v965_v39  ;;  %v942_v39 = vmul.f32 %v2859_v45, %v438_v24  ;;  %v926_v24 = vmul.f32 %v2879_v19, %v422_v4  ;;  %v910_v4 = vmul.f32 %v2899_v53, %v406_v38  ;;  %v389_v38 = vld [vmem:[%s2516_s0 + $0x410] sm:$0xff] }
 0x11f   : > { %1418 = vmatpush1.msra.mxu0 %v1037_v50  ;;  %1336 = vmatprep.subr.mxu1 %v958_v62  ;;  %v430_v50 = vld [vmem:[%s2516_s0 + $0x558] sm:$0xff]  ;;  %v429_v62 = vld [vmem:[%s2516_s0 + $0x550] sm:$0xff] }
 0x120   : > { %1159 = vmatmul.mubr.f32.gmra.mxu0 %v2963_v51  ;;  %1419 = vmatprep.subr.mxu0 %v1030_v0  ;;  %v3002_v0 = vld [vmem:[#allocation2 + $0x58] sm:$0xff]  ;;  %v933_v12 = vmul.f32 %v2877_v18, %v429_v62  ;;  %v917_v62 = vmul.f32 %v2897_v52, %v413_v33 }
 0x121   : > { %1265 = vmatprep.mubr.f32.mxu1 %v3548_v17  ;;  %1337 = vmatpush2.msra.mxu1 %v957_v6  ;;  %v934_v6 = vmul.f32 %v2877_v18, %v430_v50  ;;  %v3026_v50 = vld [vmem:[#allocation2 + $0x60] sm:$0xff] }
 0x122   : > { %1420 = vmatpush1.msra.mxu0 %v1029_v7  ;;  %2097 = vmatmul.mubr.msk.f32.gmra.mxu1 %vm1069_vm0, %v2975_v10  ;;  %v3007_v7 = vld [vmem:[#allocation2 + $0x48] sm:$0xff] }
 0x123   : > { %1338 = vmatprep.subr.mxu1 %v950_v22  ;;  %1421 = vmatprep.subr.mxu0 %v1022_v32  ;;  %v414_v22 = vld [vmem:[%s2516_s0 + $0x4d8] sm:$0xff] }
 0x124   : > { %1164 = vmatprep.mubr.f32.mxu0 %v2981_v23  ;;  %1339 = vmatpush2.msra.mxu1 %v949_v34  ;;  %v3016_v32 = vld [vmem:[#allocation2 + $0x68] sm:$0xff]  ;;  %v925_v34 = vmul.f32 %v2879_v19, %v421_v11  ;;  %v397_v11 = vld [vmem:[%s2516_s0 + $0x450] sm:$0xff]  ;;  %v528_v19 = vld [vmem:[%s2516_s0 + $0x868] sm:$0xff] }
 0x125   : > { %1422 = vmatpush1.msra.mxu0 %v1021_v36  ;;  %1340 = vmatprep.subr.mxu1 %v942_v39  ;;  %v3021_v36 = vld [vmem:[#allocation2 + $0x70] sm:$0xff]  ;;  %v918_v39 = vmul.f32 %v2897_v52, %v414_v22  ;;  %v3040_v22 = vld [vmem:[#allocation2 + $0x88] sm:$0xff]  ;;  %v368_v52 = vld [vmem:[%s2516_s0 + $0x368] sm:$0xff] }
 0x126   : > { %1165 = vmatmul.mubr.f32.gmra.mxu0 %v2990_v37  ;;  %1617 = vmatprep.subr.mxu0 %v1048_v60  ;;  %v405_v60 = vld [vmem:[%s2516_s0 + $0x490] sm:$0xff] }
 0x127   : > { %1271 = vmatprep.mubr.f32.mxu1 %v3548_v17  ;;  %1341 = vmatpush2.msra.mxu1 %v941_v63  ;;  %v398_v63 = vld [vmem:[%s2516_s0 + $0x458] sm:$0xff] }
 0x128   : > { %1170 = vmatprep.mubr.f32.mxu0 %v2997_v61  ;;  %2098 = vmatmul.mubr.msk.f32.gmra.mxu1 %vm1069_vm0, %v3002_v0  ;;  %v902_v33 = vmul.f32 %v2917_v26, %v398_v63  ;;  %v893_v63 = vmul.f32 %v2919_v27, %v389_v38  ;;  %v535_v38 = vld [vmem:[%s2516_s0 + $0x8a0] sm:$0xff] }
 0x129   : > { %1342 = vmatprep.subr.mxu1 %v934_v6  ;;  %1277 = vmatprep.mubr.f32.mxu1 %v3548_v17  ;;  %v3035_v6 = vld [vmem:[#allocation2 + $0x80] sm:$0xff] }
 0x12a   : > { %1343 = vmatpush2.msra.mxu1 %v933_v12  ;;  %1171 = vmatmul.mubr.f32.gmra.mxu0 %v3007_v7  ;;  %v909_v12 = vmul.f32 %v2899_v53, %v405_v60  ;;  %v384_v60 = vld [vmem:[%s2516_s0 + $0x3e8] sm:$0xff]  ;;  %v3579_v53 = vmov 0.0  }
 0x12b   : > { %1344 = vmatprep.subr.mxu1 %v926_v24  ;;  %1176 = vmatprep.mubr.f32.mxu0 %v3016_v32  ;;  %v390_v24 = vld [vmem:[%s2516_s0 + $0x418] sm:$0xff] }
 0x12c   : > { %1345 = vmatpush2.msra.mxu1 %v925_v34  ;;  %v3045_v34 = vld [vmem:[#allocation2 + $0x78] sm:$0xff] }
 0x12d   : > { %2099 = vmatmul.mubr.msk.f32.gmra.mxu1 %vm1069_vm0, %v3021_v36  ;;  %1346 = vmatprep.subr.mxu1 %v918_v39  ;;  %3577 = vst [vmem:[#allocation16_spill] sm:$0xff] %v3045_v34  ;;  %v901_v39 = vmul.f32 %v2917_v26, %v397_v11  ;;  %v3059_v11 = vld [vmem:[#allocation2 + $0x8] sm:$0xff]  ;;  %v888_v26 = vmul.f32 %v2633_v41, %v384_v60 }
 0x12e   : > { %1347 = vmatpush2.msra.mxu1 %v917_v62  ;;  %1177 = vmatmul.mubr.f32.gmra.mxu0 %v3026_v50  ;;  %v894_v62 = vmul.f32 %v2919_v27, %v390_v24  ;;  %3578 = vst [vmem:[#allocation17_spill] sm:$0xff] %v3059_v11  ;;  %v536_v24 = vld [vmem:[%s2516_s0 + $0x8a8] sm:$0xff]  ;;  %v367_v27 = vld [vmem:[%s2516_s0 + $0x360] sm:$0xff] }
 0x12f   : > { %1348 = vmatprep.subr.mxu1 %v910_v4  ;;  %1283 = vmatprep.mubr.f32.mxu1 %v3548_v17  ;;  %v383_v4 = vld [vmem:[%s2516_s0 + $0x3e0] sm:$0xff] }
 0x130   : > { %1349 = vmatpush2.msra.mxu1 %v909_v12  ;;  %1182 = vmatprep.mubr.f32.mxu0 %v3035_v6  ;;  %v376_v12 = vld [vmem:[%s2516_s0 + $0x3a8] sm:$0xff]  ;;  %v543_v17 = vld [vmem:[%s2516_s0 + $0x8e0] sm:$0xff] }
 0x131   : > { %2100 = vmatmul.mubr.msk.f32.gmra.mxu1 %vm1069_vm0, %v3040_v22  ;;  %1350 = vmatprep.subr.mxu1 %v902_v33  ;;  %v375_v33 = vld [vmem:[%s2516_s0 + $0x3a0] sm:$0xff]  ;;  %v1047_v60 = vmul.f32 %v2678_v14, %v543_v17  ;;  %v1039_v17 = vmul.f32 %v2694_v29, %v535_v38 }
 0x132   : > { %1351 = vmatpush2.msra.mxu1 %v901_v39  ;;  %1183 = vmatmul.mubr.f32.gmra.mxu0 %v3045_v34  ;;  %v887_v39 = vmul.f32 %v2633_v41, %v383_v4  ;;  %v1040_v4 = vmul.f32 %v2694_v29, %v536_v24  ;;  %v1032_v24 = vmul.f32 %v2707_v40, %v528_v19  ;;  %v519_v38 = vld [vmem:[%s2516_s0 + $0x820] sm:$0xff] }
 0x133   : > { %1352 = vmatprep.subr.mxu1 %v894_v62  ;;  %1354 = vmatprep.mubr.f32.mxu1 %v3059_v11  ;;  %v880_v62 = vmul.f32 %v2641_v47, %v376_v12  ;;  %v360_v12 = vld [vmem:[%s2516_s0 + $0x328] sm:$0xff] }
 0x134   : > { %1353 = vmatpush2.msra.mxu1 %v893_v63  ;;  %1455 = vmatprep.mubr.f32.mxu0 %v3579_v53  ;;  %v879_v63 = vmul.f32 %v2641_v47, %v375_v33  ;;  %v871_v33 = vmul.f32 %v2635_v42, %v367_v27 }
 0x135   : > { %1355 = vmatmul.mubr.f32.vlgmr.msra.gmra.mxu1 %v2937_v5  ;;  %1492 = vmatprep.subr.mxu1 %v888_v26  ;;  %v872_v26 = vmul.f32 %v2635_v42, %v368_v52  ;;  %v352_v52 = vld [vmem:[%s2516_s0 + $0x2e8] sm:$0xff] }
 0x136   : > { %1493 = vmatpush1.msra.mxu1 %v887_v39  ;;  %2101 = vmatmul.mubr.msk.f32.vlgmr.msra.gmra.mxu0 %vm1069_vm0, %v2730_v1  ;;  %v527_v1 = vld [vmem:[%s2516_s0 + $0x860] sm:$0xff] }
 0x137   : > { %1494 = vmatprep.subr.mxu1 %v880_v62  ;;  %1618 = vmatpush1.msra.mxu0 %v1047_v60  ;;  %v359_v39 = vld [vmem:[%s2516_s0 + $0x320] sm:$0xff]  ;;  %v520_v62 = vld [vmem:[%s2516_s0 + $0x828] sm:$0xff]  ;;  %v864_v60 = vmul.f32 %v2643_v48, %v360_v12  ;;  %v1023_v12 = vmul.f32 %v2719_v54, %v519_v38 }
 0x138   : > { %1495 = vmatpush1.msra.mxu1 %v879_v63  ;;  %1619 = vmatprep.subr.mxu0 %v1040_v4  ;;  %v1031_v63 = vmul.f32 %v2707_v40, %v527_v1  ;;  %v863_v19 = vmul.f32 %v2643_v48, %v359_v39  ;;  %v1024_v27 = vmul.f32 %v2719_v54, %v520_v62  ;;  %v351_v4 = vld [vmem:[%s2516_s0 + $0x2e0] sm:$0xff]  ;;  %v344_v1 = vld [vmem:[%s2516_s0 + $0x2a8] sm:$0xff] }
 0x139   : > { %1496 = vmatprep.subr.mxu1 %v872_v26  ;;  %1620 = vmatpush1.msra.mxu0 %v1039_v17  ;;  %v386_v26 = vld [vmem:[%s2516_s0 + $0x3f8] sm:$0xff]  ;;  %v856_v17 = vmul.f32 %v2652_v56, %v352_v52  ;;  %v343_v39 = vld [vmem:[%s2516_s0 + $0x2a0] sm:$0xff]  ;;  %v336_v62 = vld [vmem:[%s2516_s0 + $0x268] sm:$0xff]  ;;  %v848_v52 = vmul.f32 %v2654_v57, %v344_v1 }
 0x13a   : > { %1360 = vmatprep.mubr.f32.mxu1 %v2954_v35  ;;  %1461 = vmatprep.mubr.f32.mxu0 %v3579_v53  ;;  %v335_v38 = vld [vmem:[%s2516_s0 + $0x260] sm:$0xff] }
 0x13b   : > { %1497 = vmatpush1.msra.mxu1 %v871_v33  ;;  %1621 = vmatprep.subr.mxu0 %v1032_v24  ;;  %v855_v33 = vmul.f32 %v2652_v56, %v351_v4  ;;  %v890_v24 = vmul.f32 %v2633_v41, %v386_v26  ;;  %v839_v4 = vmul.f32 %v2664_v2, %v335_v38  ;;  %v320_v26 = vld [vmem:[%s2516_s0 + $0x1e8] sm:$0xff] }
 0x13c   : > { %1361 = vmatmul.mubr.f32.gmra.mxu1 %v2963_v51  ;;  %2102 = vmatmul.mubr.msk.f32.gmra.mxu0 %vm1069_vm0, %v2948_v25 }
 0x13d   : > { %1498 = vmatprep.subr.mxu1 %v864_v60  ;;  %1622 = vmatpush1.msra.mxu0 %v1031_v63  ;;  %v847_v60 = vmul.f32 %v2654_v57, %v343_v39  ;;  %v328_v63 = vld [vmem:[%s2516_s0 + $0x228] sm:$0xff]  ;;  %v311_v39 = vld [vmem:[%s2516_s0 + $0x1a0] sm:$0xff] }
 0x13e   : > { %1499 = vmatpush1.msra.mxu1 %v863_v19  ;;  %1623 = vmatprep.subr.mxu0 %v1024_v27  ;;  %v840_v19 = vmul.f32 %v2664_v2, %v336_v62  ;;  %v327_v27 = vld [vmem:[%s2516_s0 + $0x220] sm:$0xff] }
 0x13f   : > { %1500 = vmatprep.subr.mxu1 %v856_v17  ;;  %1624 = vmatpush1.msra.mxu0 %v1023_v12  ;;  %v832_v17 = vmul.f32 %v2666_v3, %v328_v63  ;;  %v319_v12 = vld [vmem:[%s2516_s0 + $0x1e0] sm:$0xff]  ;;  %v831_v1 = vmul.f32 %v2666_v3, %v327_v27  ;;  %v815_v63 = vmul.f32 %v2696_v30, %v311_v39  ;;  %v385_v39 = vld [vmem:[%s2516_s0 + $0x3f0] sm:$0xff] }
 0x140   : > { %1366 = vmatprep.mubr.f32.mxu1 %v2981_v23  ;;  %1467 = vmatprep.mubr.f32.mxu0 %v3579_v53  ;;  %v823_v62 = vmul.f32 %v2680_v15, %v319_v12 }
 0x141   : > { %1501 = vmatpush1.msra.mxu1 %v855_v33  ;;  %1694 = vmatprep.subr.mxu0 %v890_v24  ;;  %v312_v33 = vld [vmem:[%s2516_s0 + $0x1a8] sm:$0xff]  ;;  %v824_v24 = vmul.f32 %v2680_v15, %v320_v26 }
 0x142   : > { %1367 = vmatmul.mubr.f32.gmra.mxu1 %v2990_v37  ;;  %2103 = vmatmul.mubr.msk.f32.gmra.mxu0 %vm1069_vm0, %v2975_v10  ;;  %v816_v38 = vmul.f32 %v2696_v30, %v312_v33 }
 0x143   : > { %1502 = vmatprep.subr.mxu1 %v848_v52  ;;  %1372 = vmatprep.mubr.f32.mxu1 %v2997_v61  ;;  %v304_v52 = vld [vmem:[%s2516_s0 + $0x168] sm:$0xff] }
 0x144   : > { %1503 = vmatpush1.msra.mxu1 %v847_v60  ;;  %1473 = vmatprep.mubr.f32.mxu0 %v3579_v53  ;;  %v303_v60 = vld [vmem:[%s2516_s0 + $0x160] sm:$0xff]  ;;  %v808_v27 = vmul.f32 %v2709_v43, %v304_v52 }
 0x145   : > { %1504 = vmatprep.subr.mxu1 %v840_v19  ;;  %v296_v19 = vld [vmem:[%s2516_s0 + $0x128] sm:$0xff]  ;;  %v807_v26 = vmul.f32 %v2709_v43, %v303_v60  ;;  %v279_v52 = vld [vmem:[%s2516_s0 + $0xa0] sm:$0xff] }
 0x146   : > { %1505 = vmatpush1.msra.mxu1 %v839_v4  ;;  %2104 = vmatmul.mubr.msk.f32.gmra.mxu0 %vm1069_vm0, %v3002_v0  ;;  %v295_v4 = vld [vmem:[%s2516_s0 + $0x120] sm:$0xff]  ;;  %v800_v12 = vmul.f32 %v2721_v55, %v296_v19  ;;  %v377_v19 = vld [vmem:[%s2516_s0 + $0x3b0] sm:$0xff] }
 0x147   : > { %1373 = vmatmul.mubr.f32.gmra.mxu1 %v3007_v7  ;;  %1506 = vmatprep.subr.mxu1 %v832_v17  ;;  %v288_v17 = vld [vmem:[%s2516_s0 + $0xe8] sm:$0xff]  ;;  %v799_v33 = vmul.f32 %v2721_v55, %v295_v4  ;;  %v889_v4 = vmul.f32 %v2633_v41, %v385_v39  ;;  %v881_v39 = vmul.f32 %v2641_v47, %v377_v19  ;;  %v511_v19 = vld [vmem:[%s2516_s0 + $0x7e0] sm:$0xff] }
 0x148   : > { %1507 = vmatpush1.msra.mxu1 %v831_v1  ;;  %1378 = vmatprep.mubr.f32.mxu1 %v3016_v32  ;;  %v287_v1 = vld [vmem:[%s2516_s0 + $0xe0] sm:$0xff] }
 0x149   : > { %1508 = vmatprep.subr.mxu1 %v824_v24  ;;  %1479 = vmatprep.mubr.f32.mxu0 %v3579_v53  ;;  %v280_v24 = vld [vmem:[%s2516_s0 + $0xa8] sm:$0xff]  ;;  %v791_v60 = vmul.f32 %v2736_v8, %v287_v1  ;;  %v783_v1 = vmul.f32 %v2738_v9, %v279_v52 }
 0x14a   : > { %1509 = vmatpush1.msra.mxu1 %v823_v62  ;;  %2105 = vmatmul.mubr.msk.f32.gmra.mxu0 %vm1069_vm0, %v3021_v36  ;;  %v792_v62 = vmul.f32 %v2736_v8, %v288_v17  ;;  %v370_v17 = vld [vmem:[%s2516_s0 + $0x378] sm:$0xff] }
 0x14b   : > { %1379 = vmatmul.mubr.f32.gmra.mxu1 %v3026_v50  ;;  %1510 = vmatprep.subr.mxu1 %v816_v38  ;;  %v378_v38 = vld [vmem:[%s2516_s0 + $0x3b8] sm:$0xff] }
 0x14c   : > { %1511 = vmatpush1.msra.mxu1 %v815_v63  ;;  %1384 = vmatprep.mubr.f32.mxu1 %v3035_v6  ;;  %v272_v63 = vld [vmem:[%s2516_s0 + $0x68] sm:$0xff] }
 0x14d   : > { %1512 = vmatprep.subr.mxu1 %v808_v27  ;;  %1485 = vmatprep.mubr.f32.mxu0 %v3579_v53  ;;  %v784_v27 = vmul.f32 %v2738_v9, %v280_v24  ;;  %v264_v24 = vld [vmem:[%s2516_s0 + $0x28] sm:$0xff]  ;;  %v776_v41 = vmul.f32 %v2757_v28, %v272_v63 }
 0x14e   : > { %1513 = vmatpush1.msra.mxu1 %v807_v26  ;;  %2106 = vmatmul.mubr.msk.f32.gmra.mxu0 %vm1069_vm0, %v3040_v22  ;;  %v271_v26 = vld [vmem:[%s2516_s0 + $0x60] sm:$0xff]  ;;  %v768_v63 = vmul.f32 %v2759_v31, %v264_v24 }
 0x14f   : > { %1385 = vmatmul.mubr.f32.gmra.mxu1 %v3045_v34  ;;  %1514 = vmatprep.subr.mxu1 %v800_v12  ;;  %v3167_v12 = vld [vmem:[#allocation2 + $0x10] sm:$0xff]  ;;  %v775_v52 = vmul.f32 %v2757_v28, %v271_v26  ;;  %v361_v34 = vld [vmem:[%s2516_s0 + $0x330] sm:$0xff] }
 0x150   : > { %1515 = vmatpush1.msra.mxu1 %v799_v33  ;;  %1657 = vmatprep.mubr.f32.mxu0 %v3579_v53  ;;  %3580 = vst [vmem:[#allocation18_spill] sm:$0xff] %v3167_v12  ;;  %v882_v33 = vmul.f32 %v2641_v47, %v378_v38  ;;  %v874_v38 = vmul.f32 %v2635_v42, %v370_v17  ;;  %v504_v17 = vld [vmem:[%s2516_s0 + $0x7a8] sm:$0xff]  ;;  %v503_v24 = vld [vmem:[%s2516_s0 + $0x7a0] sm:$0xff] }
 0x151   : > { %1516 = vmatprep.subr.mxu1 %v792_v62  ;;  %1556 = vmatprep.mubr.f32.mxu1 %v3059_v11  ;;  %v369_v62 = vld [vmem:[%s2516_s0 + $0x370] sm:$0xff]  ;;  %v362_v11 = vld [vmem:[%s2516_s0 + $0x338] sm:$0xff] }
 0x152   : > { %1517 = vmatpush1.msra.mxu1 %v791_v60  ;;  %2107 = vmatmul.mubr.msk.f32.vlgmr.msra.gmra.mxu0 %vm1069_vm0, %v3167_v12  ;;  %v263_v60 = vld [vmem:[%s2516_s0 + $0x20] sm:$0xff]  ;;  %v512_v12 = vld [vmem:[%s2516_s0 + $0x7e8] sm:$0xff]  ;;  %v873_v47 = vmul.f32 %v2635_v42, %v369_v62  ;;  %v866_v26 = vmul.f32 %v2643_v48, %v362_v11  ;;  %v865_v42 = vmul.f32 %v2643_v48, %v361_v34  ;;  %v346_v62 = vld [vmem:[%s2516_s0 + $0x2b8] sm:$0xff] }
 0x153   : > { %1518 = vmatprep.subr.mxu1 %v784_v27  ;;  %1695 = vmatpush1.msra.mxu0 %v889_v4  ;;  %v354_v27 = vld [vmem:[%s2516_s0 + $0x2f8] sm:$0xff]  ;;  %v767_v4 = vmul.f32 %v2759_v31, %v263_v60  ;;  %v345_v60 = vld [vmem:[%s2516_s0 + $0x2b0] sm:$0xff]  ;;  %v495_v34 = vld [vmem:[%s2516_s0 + $0x760] sm:$0xff] }
 0x154   : > { %1519 = vmatpush1.msra.mxu1 %v783_v1  ;;  %1696 = vmatprep.subr.mxu0 %v882_v33  ;;  %v353_v1 = vld [vmem:[%s2516_s0 + $0x2f0] sm:$0xff]  ;;  %v1016_v33 = vmul.f32 %v2777_v58, %v512_v12  ;;  %v858_v11 = vmul.f32 %v2652_v56, %v354_v27  ;;  %v1008_v12 = vmul.f32 %v2779_v59, %v504_v17 }
 0x155   : > { %1520 = vmatprep.subr.mxu1 %v776_v41  ;;  %1697 = vmatpush1.msra.mxu0 %v881_v39  ;;  %v1015_v41 = vmul.f32 %v2777_v58, %v511_v19  ;;  %v496_v39 = vld [vmem:[%s2516_s0 + $0x768] sm:$0xff]  ;;  %v857_v48 = vmul.f32 %v2652_v56, %v353_v1  ;;  %v337_v19 = vld [vmem:[%s2516_s0 + $0x270] sm:$0xff]  ;;  %v849_v56 = vmul.f32 %v2654_v57, %v345_v60 }
 0x156   : > { %1521 = vmatpush1.msra.mxu1 %v775_v52  ;;  %1698 = vmatprep.subr.mxu0 %v874_v38  ;;  %v338_v52 = vld [vmem:[%s2516_s0 + $0x278] sm:$0xff]  ;;  %v1007_v38 = vmul.f32 %v2779_v59, %v503_v24  ;;  %v1000_v27 = vmul.f32 %v2797_v20, %v496_v39  ;;  %v999_v17 = vmul.f32 %v2797_v20, %v495_v34  ;;  %v472_v60 = vld [vmem:[%s2516_s0 + $0x6a8] sm:$0xff]  ;;  %v471_v34 = vld [vmem:[%s2516_s0 + $0x6a0] sm:$0xff] }
 0x157   : > { %1522 = vmatprep.subr.mxu1 %v768_v63  ;;  %1699 = vmatpush1.msra.mxu0 %v873_v47  ;;  %v850_v63 = vmul.f32 %v2654_v57, %v346_v62  ;;  %v488_v47 = vld [vmem:[%s2516_s0 + $0x728] sm:$0xff]  ;;  %v842_v1 = vmul.f32 %v2664_v2, %v338_v52  ;;  %v841_v57 = vmul.f32 %v2664_v2, %v337_v19  ;;  %v479_v62 = vld [vmem:[%s2516_s0 + $0x6e0] sm:$0xff]  ;;  %v314_v52 = vld [vmem:[%s2516_s0 + $0x1b8] sm:$0xff] }
 0x158   : > { %1523 = vmatpush1.msra.mxu1 %v767_v4  ;;  %1700 = vmatprep.subr.mxu0 %v866_v26  ;;  %v487_v4 = vld [vmem:[%s2516_s0 + $0x720] sm:$0xff]  ;;  %v330_v26 = vld [vmem:[%s2516_s0 + $0x238] sm:$0xff]  ;;  %v992_v24 = vmul.f32 %v2799_v21, %v488_v47  ;;  %v464_v47 = vld [vmem:[%s2516_s0 + $0x668] sm:$0xff] }
 0x159   : > { %1524 = vmatprep.subr.mxu1 %v1016_v33  ;;  %1701 = vmatpush1.msra.mxu0 %v865_v42  ;;  %v480_v33 = vld [vmem:[%s2516_s0 + $0x6e8] sm:$0xff]  ;;  %v329_v42 = vld [vmem:[%s2516_s0 + $0x230] sm:$0xff]  ;;  %v834_v39 = vmul.f32 %v2666_v3, %v330_v26  ;;  %v975_v26 = vmul.f32 %v2819_v49, %v471_v34 }
 0x15a   : > { %1525 = vmatpush2.msra.mxu1 %v1015_v41  ;;  %1702 = vmatprep.subr.mxu0 %v858_v11  ;;  %v322_v41 = vld [vmem:[%s2516_s0 + $0x1f8] sm:$0xff]  ;;  %v991_v11 = vmul.f32 %v2799_v21, %v487_v4  ;;  %v833_v2 = vmul.f32 %v2666_v3, %v329_v42  ;;  %v313_v19 = vld [vmem:[%s2516_s0 + $0x1b0] sm:$0xff]  ;;  %v968_v42 = vmul.f32 %v2837_v13, %v464_v47  ;;  %v439_v47 = vld [vmem:[%s2516_s0 + $0x5a0] sm:$0xff] }
 0x15b   : > { %1526 = vmatprep.subr.mxu1 %v1008_v12  ;;  %1703 = vmatpush1.msra.mxu0 %v857_v48  ;;  %v321_v12 = vld [vmem:[%s2516_s0 + $0x1f0] sm:$0xff]  ;;  %v984_v48 = vmul.f32 %v2817_v46, %v480_v33  ;;  %v306_v4 = vld [vmem:[%s2516_s0 + $0x178] sm:$0xff] }
 0x15c   : > { %1527 = vmatpush2.msra.mxu1 %v1007_v38  ;;  %1704 = vmatprep.subr.mxu0 %v850_v63  ;;  %v983_v38 = vmul.f32 %v2817_v46, %v479_v62  ;;  %v826_v63 = vmul.f32 %v2680_v15, %v322_v41  ;;  %v825_v3 = vmul.f32 %v2680_v15, %v321_v12  ;;  %v305_v33 = vld [vmem:[%s2516_s0 + $0x170] sm:$0xff]  ;;  %v447_v12 = vld [vmem:[%s2516_s0 + $0x5e0] sm:$0xff] }
 0x15d   : > { %1528 = vmatprep.subr.mxu1 %v1000_v27  ;;  %1705 = vmatpush1.msra.mxu0 %v849_v56  ;;  %v976_v27 = vmul.f32 %v2819_v49, %v472_v60  ;;  %v463_v56 = vld [vmem:[%s2516_s0 + $0x660] sm:$0xff]  ;;  %v817_v15 = vmul.f32 %v2696_v30, %v313_v19  ;;  %v810_v41 = vmul.f32 %v2709_v43, %v306_v4  ;;  %v282_v19 = vld [vmem:[%s2516_s0 + $0xb8] sm:$0xff]  ;;  %v281_v4 = vld [vmem:[%s2516_s0 + $0xb0] sm:$0xff] }
 0x15e   : > { %1529 = vmatpush2.msra.mxu1 %v999_v17  ;;  %1706 = vmatprep.subr.mxu0 %v842_v1  ;;  %v818_v17 = vmul.f32 %v2696_v30, %v314_v52  ;;  %v456_v1 = vld [vmem:[%s2516_s0 + $0x628] sm:$0xff]  ;;  %v967_v62 = vmul.f32 %v2837_v13, %v463_v56  ;;  %v809_v30 = vmul.f32 %v2709_v43, %v305_v33 }
 0x15f   : > { %1530 = vmatprep.subr.mxu1 %v992_v24  ;;  %1707 = vmatpush1.msra.mxu0 %v841_v57  ;;  %v455_v24 = vld [vmem:[%s2516_s0 + $0x620] sm:$0xff]  ;;  %v298_v57 = vld [vmem:[%s2516_s0 + $0x138] sm:$0xff]  ;;  %v960_v60 = vmul.f32 %v2839_v16, %v456_v1  ;;  %v440_v52 = vld [vmem:[%s2516_s0 + $0x5a8] sm:$0xff]  ;;  %v943_v33 = vmul.f32 %v2859_v45, %v439_v47 }
 0x160   : > { %1531 = vmatpush2.msra.mxu1 %v991_v11  ;;  %1708 = vmatprep.subr.mxu0 %v834_v39  ;;  %v448_v11 = vld [vmem:[%s2516_s0 + $0x5e8] sm:$0xff]  ;;  %v297_v39 = vld [vmem:[%s2516_s0 + $0x130] sm:$0xff]  ;;  %v802_v34 = vmul.f32 %v2721_v55, %v298_v57  ;;  %v274_v1 = vld [vmem:[%s2516_s0 + $0x78] sm:$0xff] }
 0x161   : > { %1532 = vmatprep.subr.mxu1 %v984_v48  ;;  %1709 = vmatpush1.msra.mxu0 %v833_v2  ;;  %v290_v48 = vld [vmem:[%s2516_s0 + $0xf8] sm:$0xff]  ;;  %v959_v2 = vmul.f32 %v2839_v16, %v455_v24  ;;  %v801_v43 = vmul.f32 %v2721_v55, %v297_v39  ;;  %v432_v56 = vld [vmem:[%s2516_s0 + $0x568] sm:$0xff]  ;;  %v273_v24 = vld [vmem:[%s2516_s0 + $0x70] sm:$0xff]  ;;  %v778_v39 = vmul.f32 %v2757_v28, %v274_v1 }
 0x162   : > { %1533 = vmatpush2.msra.mxu1 %v983_v38  ;;  %1710 = vmatprep.subr.mxu0 %v826_v63  ;;  %v289_v38 = vld [vmem:[%s2516_s0 + $0xf0] sm:$0xff]  ;;  %v952_v63 = vmul.f32 %v2857_v44, %v448_v11  ;;  %v936_v57 = vmul.f32 %v2877_v18, %v432_v56  ;;  %v3582_v47 = vld [vmem:[#allocation12_spill] sm:$0xff] }
 0x163   : > { %1534 = vmatprep.subr.mxu1 %v976_v27  ;;  %1711 = vmatpush1.msra.mxu0 %v825_v3  ;;  %v951_v27 = vmul.f32 %v2857_v44, %v447_v12  ;;  %v794_v3 = vmul.f32 %v2736_v8, %v290_v48  ;;  %v793_v55 = vmul.f32 %v2736_v8, %v289_v38  ;;  %v3581_v12 = vld [vmem:[#allocation11_spill] sm:$0xff] }
 0x164   : > { %1535 = vmatpush2.msra.mxu1 %v975_v26  ;;  %1712 = vmatprep.subr.mxu0 %v818_v17  ;;  %v944_v26 = vmul.f32 %v2859_v45, %v440_v52  ;;  %v431_v17 = vld [vmem:[%s2516_s0 + $0x560] sm:$0xff]  ;;  %v785_v8 = vmul.f32 %v2738_v9, %v281_v4 }
 0x165   : > { %1536 = vmatprep.subr.mxu1 %v968_v42  ;;  %1713 = vmatpush1.msra.mxu0 %v817_v15  ;;  %v786_v42 = vmul.f32 %v2738_v9, %v282_v19  ;;  %v424_v15 = vld [vmem:[%s2516_s0 + $0x528] sm:$0xff]  ;;  %v935_v11 = vmul.f32 %v2877_v18, %v431_v17  ;;  %v777_v9 = vmul.f32 %v2757_v28, %v273_v24  ;;  %v3583_v17 = vld [vmem:[#allocation13_spill] sm:$0xff] }
 0x166   : > { %1537 = vmatpush2.msra.mxu1 %v967_v62  ;;  %1714 = vmatprep.subr.mxu0 %v810_v41  ;;  %v423_v62 = vld [vmem:[%s2516_s0 + $0x520] sm:$0xff]  ;;  %v266_v41 = vld [vmem:[%s2516_s0 + $0x38] sm:$0xff]  ;;  %v928_v48 = vmul.f32 %v3581_v12, %v424_v15 }
 0x167   : > { %1538 = vmatprep.subr.mxu1 %v960_v60  ;;  %1715 = vmatpush1.msra.mxu0 %v809_v30  ;;  %v416_v60 = vld [vmem:[%s2516_s0 + $0x4e8] sm:$0xff]  ;;  %v265_v30 = vld [vmem:[%s2516_s0 + $0x30] sm:$0xff]  ;;  %v927_v52 = vmul.f32 %v3581_v12, %v423_v62  ;;  %v770_v38 = vmul.f32 %v2759_v31, %v266_v41  ;;  %v3584_v62 = vld [vmem:[#allocation14_spill] sm:$0xff] }
 0x168   : > { %1539 = vmatpush2.msra.mxu1 %v959_v2  ;;  %1716 = vmatprep.subr.mxu0 %v802_v34  ;;  %v415_v2 = vld [vmem:[%s2516_s0 + $0x4e0] sm:$0xff]  ;;  %v514_v34 = vld [vmem:[%s2516_s0 + $0x7f8] sm:$0xff]  ;;  %v920_v19 = vmul.f32 %v3582_v47, %v416_v60  ;;  %v769_v28 = vmul.f32 %v2759_v31, %v265_v30 }
 0x169   : > { %1540 = vmatprep.subr.mxu1 %v952_v63  ;;  %1717 = vmatpush1.msra.mxu0 %v801_v43  ;;  %v408_v63 = vld [vmem:[%s2516_s0 + $0x4a8] sm:$0xff]  ;;  %v513_v43 = vld [vmem:[%s2516_s0 + $0x7f0] sm:$0xff]  ;;  %v919_v56 = vmul.f32 %v3582_v47, %v415_v2  ;;  %v1018_v4 = vmul.f32 %v2777_v58, %v514_v34 }
 0x16a   : > { %1541 = vmatpush2.msra.mxu1 %v951_v27  ;;  %1718 = vmatprep.subr.mxu0 %v794_v3  ;;  %v407_v27 = vld [vmem:[%s2516_s0 + $0x4a0] sm:$0xff]  ;;  %v506_v3 = vld [vmem:[%s2516_s0 + $0x7b8] sm:$0xff]  ;;  %v912_v1 = vmul.f32 %v3583_v17, %v408_v63  ;;  %v1017_v31 = vmul.f32 %v2777_v58, %v513_v43  ;;  %v545_v43 = vld [vmem:[%s2516_s0 + $0x8f0] sm:$0xff] }
 0x16b   : > { %1542 = vmatprep.subr.mxu1 %v944_v26  ;;  %1719 = vmatpush1.msra.mxu0 %v793_v55  ;;  %v400_v26 = vld [vmem:[%s2516_s0 + $0x468] sm:$0xff]  ;;  %v505_v55 = vld [vmem:[%s2516_s0 + $0x7b0] sm:$0xff]  ;;  %v911_v15 = vmul.f32 %v3583_v17, %v407_v27  ;;  %v1010_v24 = vmul.f32 %v2779_v59, %v506_v3  ;;  %v391_v58 = vld [vmem:[%s2516_s0 + $0x420] sm:$0xff] }
 0x16c   : > { %1543 = vmatpush2.msra.mxu1 %v943_v33  ;;  %1720 = vmatprep.subr.mxu0 %v786_v42  ;;  %v399_v33 = vld [vmem:[%s2516_s0 + $0x460] sm:$0xff]  ;;  %v498_v42 = vld [vmem:[%s2516_s0 + $0x778] sm:$0xff]  ;;  %v904_v41 = vmul.f32 %v3584_v62, %v400_v26 }
 0x16d   : > { %1544 = vmatprep.subr.mxu1 %v936_v57  ;;  %1721 = vmatpush1.msra.mxu0 %v785_v8  ;;  %v392_v57 = vld [vmem:[%s2516_s0 + $0x428] sm:$0xff]  ;;  %v497_v8 = vld [vmem:[%s2516_s0 + $0x770] sm:$0xff]  ;;  %v903_v60 = vmul.f32 %v3584_v62, %v399_v33  ;;  %v1002_v30 = vmul.f32 %v2797_v20, %v498_v42  ;;  %v538_v27 = vld [vmem:[%s2516_s0 + $0x8b8] sm:$0xff] }
 0x16e   : > { %1545 = vmatpush2.msra.mxu1 %v935_v11  ;;  %1722 = vmatprep.subr.mxu0 %v778_v39  ;;  %v1009_v11 = vmul.f32 %v2779_v59, %v505_v55  ;;  %v490_v39 = vld [vmem:[%s2516_s0 + $0x738] sm:$0xff]  ;;  %v1001_v34 = vmul.f32 %v2797_v20, %v497_v8  ;;  %v1042_v55 = vmul.f32 %v2694_v29, %v538_v27  ;;  %v465_v42 = vld [vmem:[%s2516_s0 + $0x670] sm:$0xff] }
 0x16f   : > { %1546 = vmatprep.subr.mxu1 %v928_v48  ;;  %1723 = vmatpush1.msra.mxu0 %v777_v9  ;;  %v489_v48 = vld [vmem:[%s2516_s0 + $0x730] sm:$0xff]  ;;  %v3585_v9 = vld [vmem:[#allocation15_spill] sm:$0xff]  ;;  %v482_v59 = vld [vmem:[%s2516_s0 + $0x6f8] sm:$0xff]  ;;  %v994_v63 = vmul.f32 %v2799_v21, %v490_v39 }
 0x170   : > { %1547 = vmatpush2.msra.mxu1 %v927_v52  ;;  %1724 = vmatprep.subr.mxu0 %v770_v38  ;;  %v896_v2 = vmul.f32 %v3585_v9, %v392_v57  ;;  %v546_v52 = vld [vmem:[%s2516_s0 + $0x8f8] sm:$0xff]  ;;  %v895_v38 = vmul.f32 %v3585_v9, %v391_v58  ;;  %v986_v3 = vmul.f32 %v2817_v46, %v482_v59  ;;  %v417_v59 = vld [vmem:[%s2516_s0 + $0x4f0] sm:$0xff] }
 0x171   : > { %1548 = vmatprep.subr.mxu1 %v920_v19  ;;  %1725 = vmatpush1.msra.mxu0 %v769_v28  ;;  %v481_v19 = vld [vmem:[%s2516_s0 + $0x6f0] sm:$0xff]  ;;  %v993_v28 = vmul.f32 %v2799_v21, %v489_v48  ;;  %v1050_v20 = vmul.f32 %v2678_v14, %v546_v52  ;;  %v466_v33 = vld [vmem:[%s2516_s0 + $0x678] sm:$0xff] }
 0x172   : > { %1549 = vmatpush2.msra.mxu1 %v919_v56  ;;  %1726 = vmatprep.subr.mxu0 %v1018_v4  ;;  %v474_v56 = vld [vmem:[%s2516_s0 + $0x6b8] sm:$0xff]  ;;  %v1049_v4 = vmul.f32 %v2678_v14, %v545_v43  ;;  %v985_v26 = vmul.f32 %v2817_v46, %v481_v19  ;;  %v537_v21 = vld [vmem:[%s2516_s0 + $0x8b0] sm:$0xff] }
 0x173   : > { %1550 = vmatprep.subr.mxu1 %v912_v1  ;;  %1727 = vmatpush2.msra.mxu0 %v1017_v31  ;;  %v473_v1 = vld [vmem:[%s2516_s0 + $0x6b0] sm:$0xff]  ;;  %v978_v31 = vmul.f32 %v2819_v49, %v474_v56  ;;  %v1041_v14 = vmul.f32 %v2694_v29, %v537_v21  ;;  %v458_v29 = vld [vmem:[%s2516_s0 + $0x638] sm:$0xff]  ;;  %v2216_v21 = vld [vmem:[#allocation2 + $0x30] sm:$0xff] }
 0x174   : > { %1551 = vmatpush2.msra.mxu1 %v911_v15  ;;  %1728 = vmatprep.subr.mxu0 %v1010_v24  ;;  %v529_v46 = vld [vmem:[%s2516_s0 + $0x870] sm:$0xff]  ;;  %v977_v15 = vmul.f32 %v2819_v49, %v473_v1  ;;  %v522_v24 = vld [vmem:[%s2516_s0 + $0x838] sm:$0xff]  ;;  %v962_v58 = vmul.f32 %v2839_v16, %v458_v29  ;;  %v2218_v1 = vld [vmem:[#allocation2 + $0x58] sm:$0xff] }
 0x175   : > { %1552 = vmatprep.subr.mxu1 %v904_v41  ;;  %1729 = vmatpush2.msra.mxu0 %v1009_v11  ;;  %v1033_v8 = vmul.f32 %v2707_v40, %v529_v46  ;;  %v969_v41 = vmul.f32 %v2837_v13, %v465_v42  ;;  %v521_v49 = vld [vmem:[%s2516_s0 + $0x830] sm:$0xff]  ;;  %v450_v39 = vld [vmem:[%s2516_s0 + $0x5f8] sm:$0xff] }
 0x176   : > { %1553 = vmatpush2.msra.mxu1 %v903_v60  ;;  %1730 = vmatprep.subr.mxu0 %v1002_v30  ;;  %v457_v11 = vld [vmem:[%s2516_s0 + $0x630] sm:$0xff]  ;;  %v442_v60 = vld [vmem:[%s2516_s0 + $0x5b8] sm:$0xff]  ;;  %v954_v30 = vmul.f32 %v2857_v44, %v450_v39 }
 0x177   : > { %1554 = vmatprep.subr.mxu1 %v896_v2  ;;  %1731 = vmatpush2.msra.mxu0 %v1001_v34  ;;  %v441_v48 = vld [vmem:[%s2516_s0 + $0x5b0] sm:$0xff]  ;;  %v426_v34 = vld [vmem:[%s2516_s0 + $0x538] sm:$0xff] }
 0x178   : > { %1555 = vmatpush2.msra.mxu1 %v895_v38  ;;  %1732 = vmatprep.subr.mxu0 %v994_v63  ;;  %v433_v2 = vld [vmem:[%s2516_s0 + $0x570] sm:$0xff]  ;;  %v418_v52 = vld [vmem:[%s2516_s0 + $0x4f8] sm:$0xff] }
 0x179   : > { %1557 = vmatmul.mubr.f32.vlgmr.msra.gmra.mxu1 %v2937_v5  ;;  %1733 = vmatpush2.msra.mxu0 %v993_v28  ;;  %v530_v5 = vld [vmem:[%s2516_s0 + $0x878] sm:$0xff]  ;;  %v401_v43 = vld [vmem:[%s2516_s0 + $0x470] sm:$0xff]  ;;  %v3586_v28 = vld [vmem:[#allocation16_spill] sm:$0xff] }
 0x17a   : > { %1819 = vmatprep.subr.mxu1 %v1050_v20  ;;  %1734 = vmatprep.subr.mxu0 %v986_v3  ;;  %v1034_v57 = vmul.f32 %v2707_v40, %v530_v5  ;;  %v1025_v40 = vmul.f32 %v2719_v54, %v521_v49  ;;  %v410_v38 = vld [vmem:[%s2516_s0 + $0x4b8] sm:$0xff]  ;;  %v3587_v20 = vld [vmem:[#allocation17_spill] sm:$0xff] }
 0x17b   : > { %1820 = vmatpush1.msra.mxu1 %v1049_v4  ;;  %1735 = vmatpush2.msra.mxu0 %v985_v26  ;;  %v402_v63 = vld [vmem:[%s2516_s0 + $0x478] sm:$0xff]  ;;  %v2210_v3 = vld [vmem:[#allocation2] sm:$0xff]  ;;  %v2213_v4 = vld [vmem:[#allocation2 + $0x18] sm:$0xff] }
 0x17c   : > { %1821 = vmatprep.subr.mxu1 %v1042_v55  ;;  %1562 = vmatprep.mubr.f32.mxu1 %v2954_v35  ;;  %v970_v35 = vmul.f32 %v2837_v13, %v466_v33  ;;  %v449_v13 = vld [vmem:[%s2516_s0 + $0x5f0] sm:$0xff]  ;;  %v394_v19 = vld [vmem:[%s2516_s0 + $0x438] sm:$0xff]  ;;  %v2217_v55 = vld [vmem:[#allocation2 + $0x50] sm:$0xff] }
 0x17d   : > { %1663 = vmatprep.mubr.f32.mxu0 %v3579_v53  ;;  %1736 = vmatprep.subr.mxu0 %v978_v31  ;;  %v898_v27 = vmul.f32 %v3585_v9, %v394_v19  ;;  %v2212_v56 = vld [vmem:[#allocation2 + $0x28] sm:$0xff]  ;;  %v2215_v26 = vld [vmem:[#allocation2 + $0x40] sm:$0xff]  ;;  %v2221_v33 = vld [vmem:[#allocation2 + $0x70] sm:$0xff] }
 0x17e   : > { %1822 = vmatpush1.msra.mxu1 %v1041_v14  ;;  %2108 = vmatmul.mubr.msk.f32.gmra.mxu0 %vm1069_vm0, %v2948_v25  ;;  %v1026_v25 = vmul.f32 %v2719_v54, %v522_v24  ;;  %v953_v54 = vmul.f32 %v2857_v44, %v449_v13  ;;  %v2219_v31 = vld [vmem:[#allocation2 + $0x48] sm:$0xff]  ;;  %v2222_v14 = vld [vmem:[#allocation2 + $0x60] sm:$0xff] }
 0x17f   : > { %1563 = vmatmul.mubr.f32.gmra.mxu1 %v2963_v51  ;;  %1737 = vmatpush2.msra.mxu0 %v977_v15  ;;  %v961_v51 = vmul.f32 %v2839_v16, %v457_v11  ;;  %v946_v16 = vmul.f32 %v2859_v45, %v442_v60  ;;  %v2220_v5 = vld [vmem:[#allocation2 + $0x68] sm:$0xff]  ;;  %v2223_v46 = vld [vmem:[#allocation2 + $0x80] sm:$0xff]  ;;  %v2225_v15 = vld [vmem:[#allocation2 + $0x78] sm:$0xff] }
 0x180   : > { %1823 = vmatprep.subr.mxu1 %v1034_v57  ;;  %1738 = vmatprep.subr.mxu0 %v970_v35  ;;  %v2224_v42 = vld [vmem:[#allocation2 + $0x88] sm:$0xff] }
 0x181   : > { %1824 = vmatpush1.msra.mxu1 %v1033_v8  ;;  %1739 = vmatpush2.msra.mxu0 %v969_v41 }
 0x182   : > { %1825 = vmatprep.subr.mxu1 %v1026_v25  ;;  %1568 = vmatprep.mubr.f32.mxu1 %v2981_v23  ;;  %v434_v23 = vld [vmem:[%s2516_s0 + $0x578] sm:$0xff] }
 0x183   : > { %1669 = vmatprep.mubr.f32.mxu0 %v3579_v53  ;;  %1740 = vmatprep.subr.mxu0 %v962_v58  ;;  %v938_v44 = vmul.f32 %v2877_v18, %v434_v23 }
 0x184   : > { %1826 = vmatpush1.msra.mxu1 %v1025_v40  ;;  %2109 = vmatmul.mubr.msk.f32.gmra.mxu0 %vm1069_vm0, %v2975_v10  ;;  %v945_v10 = vmul.f32 %v2859_v45, %v441_v48  ;;  %v930_v45 = vmul.f32 %v3581_v12, %v426_v34 }
 0x185   : > { %1569 = vmatmul.mubr.f32.gmra.mxu1 %v2990_v37  ;;  %1741 = vmatpush2.msra.mxu0 %v961_v51  ;;  %v425_v37 = vld [vmem:[%s2516_s0 + $0x530] sm:$0xff] }
 0x186   : > { %1742 = vmatprep.subr.mxu0 %v954_v30  ;;  %1574 = vmatprep.mubr.f32.mxu1 %v2997_v61  ;;  %v937_v61 = vmul.f32 %v2877_v18, %v433_v2  ;;  %v922_v18 = vmul.f32 %v3582_v47, %v418_v52 }
 0x187   : > { %1743 = vmatpush2.msra.mxu0 %v953_v54  ;;  %1675 = vmatprep.mubr.f32.mxu0 %v3579_v53 }
 0x188   : > { %1744 = vmatprep.subr.mxu0 %v946_v16  ;;  %2110 = vmatmul.mubr.msk.f32.gmra.mxu0 %vm1069_vm0, %v3002_v0  ;;  %v929_v0 = vmul.f32 %v3581_v12, %v425_v37  ;;  %v914_v12 = vmul.f32 %v3583_v17, %v410_v38 }
 0x189   : > { %1575 = vmatmul.mubr.f32.gmra.mxu1 %v3007_v7  ;;  %1745 = vmatpush2.msra.mxu0 %v945_v10  ;;  %v409_v7 = vld [vmem:[%s2516_s0 + $0x4b0] sm:$0xff] }
 0x18a   : > { %1746 = vmatprep.subr.mxu0 %v938_v44  ;;  %1580 = vmatprep.mubr.f32.mxu1 %v3016_v32  ;;  %v921_v32 = vmul.f32 %v3582_v47, %v417_v59  ;;  %v393_v47 = vld [vmem:[%s2516_s0 + $0x430] sm:$0xff]  ;;  %s2131_s0 = smul.u32 384, %s2512_s4 }
 0x18b   : > { %1747 = vmatpush2.msra.mxu0 %v937_v61  ;;  %1681 = vmatprep.mubr.f32.mxu0 %v3579_v53 }
 0x18c   : > { %1748 = vmatprep.subr.mxu0 %v930_v45  ;;  %2111 = vmatmul.mubr.msk.f32.gmra.mxu0 %vm1069_vm0, %v3021_v36  ;;  %v913_v36 = vmul.f32 %v3583_v17, %v409_v7  ;;  %v897_v17 = vmul.f32 %v3585_v9, %v393_v47  ;;  %v2214_v9 = vld [vmem:[#allocation2 + $0x38] sm:$0xff]  ;;  %s3420_s9 = scalar_lea.vmem [#allocation7], %s2131_s0 }
 0x18d   : > { %1581 = vmatmul.mubr.f32.gmra.mxu1 %v3026_v50  ;;  %1749 = vmatpush2.msra.mxu0 %v929_v0  ;;  %v906_v50 = vmul.f32 %v3584_v62, %v402_v63 }
 0x18e   : > { %1750 = vmatprep.subr.mxu0 %v922_v18  ;;  %1586 = vmatprep.mubr.f32.mxu1 %v3035_v6  ;;  %v905_v6 = vmul.f32 %v3584_v62, %v401_v43  ;;  %v2211_v62 = vld [vmem:[#allocation2 + $0x20] sm:$0xff] }
 0x18f   : > { %1751 = vmatpush2.msra.mxu0 %v921_v32  ;;  %1687 = vmatprep.mubr.f32.mxu0 %v3579_v53 }
 0x190   : > { %1752 = vmatprep.subr.mxu0 %v914_v12  ;;  %2112 = vmatmul.mubr.msk.f32.gmra.mxu0 %vm1069_vm0, %v3040_v22  ;;  %v3588_v22 = vld [vmem:[#allocation18_spill] sm:$0xff] }
 0x191   : > { %1587 = vmatmul.mubr.f32.gmra.mxu1 %v3586_v28  ;;  %1753 = vmatpush2.msra.mxu0 %v913_v36 }
 0x192   : > { %1754 = vmatprep.subr.mxu0 %v906_v50  ;;  %1859 = vmatprep.mubr.f32.mxu1 %v3579_v53 }
 0x193   : > { %1755 = vmatpush2.msra.mxu0 %v905_v6  ;;  %1758 = vmatprep.mubr.f32.mxu0 %v3587_v20 }
 0x194   : > { %1756 = vmatprep.subr.mxu0 %v898_v27 }
 0x195   : > { %1757 = vmatpush2.msra.mxu0 %v897_v17  ;;  %2113 = vmatmul.mubr.msk.f32.vlgmr.msra.gmra.mxu1 %vm1069_vm0, %v3588_v22 }
 0x196   : > { %1759 = vmatmul.mubr.f32.vlgmr.msra.gmra.mxu0 %v2210_v3  ;;  %1865 = vmatprep.mubr.f32.mxu1 %v3579_v53 }
 0x197   : > { %1764 = vmatprep.mubr.f32.mxu0 %v2211_v62 }
 0x199   : > { %2114 = vmatmul.mubr.msk.f32.gmra.mxu1 %vm1069_vm0, %v2212_v56 }
 0x19a   : > { %1765 = vmatmul.mubr.f32.gmra.mxu0 %v2213_v4  ;;  %1871 = vmatprep.mubr.f32.mxu1 %v3579_v53 }
 0x19b   : > { %1770 = vmatprep.mubr.f32.mxu0 %v2214_v9 }
 0x19d   : > { %2115 = vmatmul.mubr.msk.f32.gmra.mxu1 %vm1069_vm0, %v2215_v26 }
 0x19e   : > { %1771 = vmatmul.mubr.f32.gmra.mxu0 %v2216_v21  ;;  %1877 = vmatprep.mubr.f32.mxu1 %v3579_v53 }
 0x19f   : > { %1776 = vmatprep.mubr.f32.mxu0 %v2217_v55 }
 0x1a1   : > { %2116 = vmatmul.mubr.msk.f32.gmra.mxu1 %vm1069_vm0, %v2218_v1 }
 0x1a2   : > { %1777 = vmatmul.mubr.f32.gmra.mxu0 %v2219_v31  ;;  %1883 = vmatprep.mubr.f32.mxu1 %v3579_v53 }
 0x1a3   : > { %1782 = vmatprep.mubr.f32.mxu0 %v2220_v5 }
 0x1a5   : > { %2117 = vmatmul.mubr.msk.f32.gmra.mxu1 %vm1069_vm0, %v2221_v33 }
 0x1a6   : > { %1783 = vmatmul.mubr.f32.gmra.mxu0 %v2222_v14  ;;  %1889 = vmatprep.mubr.f32.mxu1 %v3579_v53 }
 0x1a7   : > { %1788 = vmatprep.mubr.f32.mxu0 %v2223_v46 }
 0x1a9   : > { %2118 = vmatmul.mubr.msk.f32.gmra.mxu1 %vm1069_vm0, %v2224_v42 }
 0x1aa   : > { %1789 = vmatmul.mubr.f32.gmra.mxu0 %v2225_v15 }
 0x1b0   : > { %v1255_v24 = vpop.f32.mrf.mxu1 }
 0x1b2   : > { %v1257_v35 = vpop.f32.mrf.mxu1 }
 0x1da   : > { %v1154_v57 = vpop.f32.mrf.mxu0 }
 0x1db   : > { %v1256_v29 = vadd.f32 %v1255_v24, %v1154_v57 }
 0x1dc   : > { %v1156_v8 = vpop.f32.mrf.mxu0  ;;  %v1261_v41 = vpop.f32.mrf.mxu1 }
 0x1dd   : > { %1896 = vst [vmem:[%s3420_s9] sm:$0xff] %v1256_v29  ;;  %v1258_v53 = vadd.f32 %v1257_v35, %v1156_v8 }
 0x1de   : > { %v1263_v49 = vpop.f32.mrf.mxu1 }
 0x1df   : > { %1897 = vst [vmem:[%s3420_s9 + $0x8] sm:$0xff] %v1258_v53 }
 0x1e0   : > { %v1160_v25 = vpop.f32.mrf.mxu0 }
 0x1e1   : > { %v1262_v11 = vadd.f32 %v1261_v41, %v1160_v25 }
 0x1e2   : > { %v1162_v58 = vpop.f32.mrf.mxu0  ;;  %v1267_v40 = vpop.f32.mrf.mxu1 }
 0x1e3   : > { %1904 = vst [vmem:[%s3420_s9 + $0x40] sm:$0xff] %v1262_v11  ;;  %v1264_v39 = vadd.f32 %v1263_v49, %v1162_v58 }
 0x1e4   : > { %v1269_v13 = vpop.f32.mrf.mxu1 }
 0x1e5   : > { %1905 = vst [vmem:[%s3420_s9 + $0x48] sm:$0xff] %v1264_v39 }
 0x1e6   : > { %v1166_v51 = vpop.f32.mrf.mxu0 }
 0x1e7   : > { %v1268_v60 = vadd.f32 %v1267_v40, %v1166_v51 }
 0x1e8   : > { %v1168_v30 = vpop.f32.mrf.mxu0  ;;  %v1273_v54 = vpop.f32.mrf.mxu1 }
 0x1e9   : > { %1912 = vst [vmem:[%s3420_s9 + $0x80] sm:$0xff] %v1268_v60  ;;  %v1270_v48 = vadd.f32 %v1269_v13, %v1168_v30 }
 0x1ea   : > { %v1172_v23 = vpop.f32.mrf.mxu0  ;;  %v1275_v2 = vpop.f32.mrf.mxu1 }
 0x1eb   : > { %1913 = vst [vmem:[%s3420_s9 + $0x88] sm:$0xff] %v1270_v48  ;;  %v1274_v16 = vadd.f32 %v1273_v54, %v1172_v23 }
 0x1ec   : > { %v1174_v10 = vpop.f32.mrf.mxu0 }
 0x1ed   : > { %1920 = vst [vmem:[%s3420_s9 + $0xc0] sm:$0xff] %v1274_v16  ;;  %v1276_v34 = vadd.f32 %v1275_v2, %v1174_v10  ;;  %v1279_v44 = vpop.f32.mrf.mxu1 }
 0x1ee   : > { %v1178_v37 = vpop.f32.mrf.mxu0 }
 0x1ef   : > { %1921 = vst [vmem:[%s3420_s9 + $0xc8] sm:$0xff] %v1276_v34  ;;  %v1280_v61 = vadd.f32 %v1279_v44, %v1178_v37  ;;  %v1281_v52 = vpop.f32.mrf.mxu1 }
 0x1f0   : > { %v1180_v45 = vpop.f32.mrf.mxu0 }
 0x1f1   : > { %1928 = vst [vmem:[%s3420_s9 + $0x100] sm:$0xff] %v1280_v61  ;;  %v1282_v59 = vadd.f32 %v1281_v52, %v1180_v45  ;;  %v1285_v0 = vpop.f32.mrf.mxu1 }
 0x1f2   : > { %v1184_v38 = vpop.f32.mrf.mxu0 }
 0x1f3   : > { %1929 = vst [vmem:[%s3420_s9 + $0x108] sm:$0xff] %v1282_v59  ;;  %v1286_v18 = vadd.f32 %v1285_v0, %v1184_v38  ;;  %v1287_v7 = vpop.f32.mrf.mxu1 }
 0x1f4   : > { %v1186_v32 = vpop.f32.mrf.mxu0 }
 0x1f5   : > { %1936 = vst [vmem:[%s3420_s9 + $0x140] sm:$0xff] %v1286_v18  ;;  %v1288_v63 = vadd.f32 %v1287_v7, %v1186_v32  ;;  %v1356_v12 = vpop.f32.mrf.mxu1 }
 0x1f6   : > { %v1457_v43 = vpop.f32.mrf.mxu0 }
 0x1f7   : > { %1937 = vst [vmem:[%s3420_s9 + $0x148] sm:$0xff] %v1288_v63  ;;  %v1458_v36 = vadd.f32 %v1457_v43, %v1356_v12  ;;  %v1358_v19 = vpop.f32.mrf.mxu1 }
 0x1f8   : > { %v1459_v50 = vpop.f32.mrf.mxu0 }
 0x1f9   : > { %1898 = vst [vmem:[%s3420_s9 + $0x10] sm:$0xff] %v1458_v36  ;;  %v1460_v47 = vadd.f32 %v1459_v50, %v1358_v19 }
 0x1fb   : > { %1899 = vst [vmem:[%s3420_s9 + $0x18] sm:$0xff] %v1460_v47 }
 0x1fc   : > { %v1362_v28 = vpop.f32.mrf.mxu1  ;;  %v1463_v6 = vpop.f32.mrf.mxu0 }
 0x1fd   : > { %v1464_v27 = vadd.f32 %v1463_v6, %v1362_v28 }
 0x1fe   : > { %v1364_v17 = vpop.f32.mrf.mxu1  ;;  %v1465_v20 = vpop.f32.mrf.mxu0 }
 0x1ff   : > { %1906 = vst [vmem:[%s3420_s9 + $0x50] sm:$0xff] %v1464_v27  ;;  %v1466_v22 = vadd.f32 %v1465_v20, %v1364_v17 }
 0x201   : > { %1907 = vst [vmem:[%s3420_s9 + $0x58] sm:$0xff] %v1466_v22 }
 0x202   : > { %v1368_v3 = vpop.f32.mrf.mxu1  ;;  %v1469_v62 = vpop.f32.mrf.mxu0 }
 0x203   : > { %v1470_v56 = vadd.f32 %v1469_v62, %v1368_v3 }
 0x204   : > { %v1370_v4 = vpop.f32.mrf.mxu1  ;;  %v1471_v9 = vpop.f32.mrf.mxu0 }
 0x205   : > { %1914 = vst [vmem:[%s3420_s9 + $0x90] sm:$0xff] %v1470_v56  ;;  %v1472_v26 = vadd.f32 %v1471_v9, %v1370_v4 }
 0x206   : > { %v1475_v21 = vpop.f32.mrf.mxu0 }
 0x207   : > { %1915 = vst [vmem:[%s3420_s9 + $0x98] sm:$0xff] %v1472_v26  ;;  %v1374_v55 = vpop.f32.mrf.mxu1 }
 0x208   : > { %v1476_v1 = vadd.f32 %v1475_v21, %v1374_v55  ;;  %v1477_v31 = vpop.f32.mrf.mxu0 }
 0x209   : > { %v1376_v5 = vpop.f32.mrf.mxu1 }
 0x20a   : > { %1922 = vst [vmem:[%s3420_s9 + $0xd0] sm:$0xff] %v1476_v1  ;;  %v1478_v33 = vadd.f32 %v1477_v31, %v1376_v5  ;;  %v1481_v14 = vpop.f32.mrf.mxu0 }
 0x20b   : > { %v1380_v46 = vpop.f32.mrf.mxu1 }
 0x20c   : > { %1923 = vst [vmem:[%s3420_s9 + $0xd8] sm:$0xff] %v1478_v33  ;;  %v1482_v42 = vadd.f32 %v1481_v14, %v1380_v46  ;;  %v1483_v15 = vpop.f32.mrf.mxu0 }
 0x20d   : > { %v1382_v24 = vpop.f32.mrf.mxu1 }
 0x20e   : > { %1930 = vst [vmem:[%s3420_s9 + $0x110] sm:$0xff] %v1482_v42  ;;  %v1484_v57 = vadd.f32 %v1483_v15, %v1382_v24  ;;  %v1487_v35 = vpop.f32.mrf.mxu0 }
 0x20f   : > { %v1386_v29 = vpop.f32.mrf.mxu1 }
 0x210   : > { %1931 = vst [vmem:[%s3420_s9 + $0x118] sm:$0xff] %v1484_v57  ;;  %v1488_v8 = vadd.f32 %v1487_v35, %v1386_v29  ;;  %v1489_v53 = vpop.f32.mrf.mxu0 }
 0x211   : > { %v1388_v41 = vpop.f32.mrf.mxu1 }
 0x212   : > { %1938 = vst [vmem:[%s3420_s9 + $0x150] sm:$0xff] %v1488_v8  ;;  %v1490_v49 = vadd.f32 %v1489_v53, %v1388_v41  ;;  %v1659_v25 = vpop.f32.mrf.mxu0 }
 0x214   : > { %1939 = vst [vmem:[%s3420_s9 + $0x158] sm:$0xff] %v1490_v49  ;;  %v1661_v39 = vpop.f32.mrf.mxu0 }
 0x239   : > { %v1558_v11 = vpop.f32.mrf.mxu1 }
 0x23a   : > { %v1660_v58 = vadd.f32 %v1659_v25, %v1558_v11 }
 0x23b   : > { %v1560_v40 = vpop.f32.mrf.mxu1 }
 0x23c   : > { %1900 = vst [vmem:[%s3420_s9 + $0x20] sm:$0xff] %v1660_v58  ;;  %v1662_v13 = vadd.f32 %v1661_v39, %v1560_v40 }
 0x23e   : > { %1901 = vst [vmem:[%s3420_s9 + $0x28] sm:$0xff] %v1662_v13  ;;  %v1665_v51 = vpop.f32.mrf.mxu0 }
 0x23f   : > { %v1564_v60 = vpop.f32.mrf.mxu1 }
 0x240   : > { %v1666_v30 = vadd.f32 %v1665_v51, %v1564_v60  ;;  %v1667_v48 = vpop.f32.mrf.mxu0 }
 0x241   : > { %v1566_v54 = vpop.f32.mrf.mxu1 }
 0x242   : > { %1908 = vst [vmem:[%s3420_s9 + $0x60] sm:$0xff] %v1666_v30  ;;  %v1668_v23 = vadd.f32 %v1667_v48, %v1566_v54 }
 0x244   : > { %1909 = vst [vmem:[%s3420_s9 + $0x68] sm:$0xff] %v1668_v23  ;;  %v1671_v16 = vpop.f32.mrf.mxu0 }
 0x245   : > { %v1570_v2 = vpop.f32.mrf.mxu1 }
 0x246   : > { %v1672_v10 = vadd.f32 %v1671_v16, %v1570_v2  ;;  %v1673_v34 = vpop.f32.mrf.mxu0 }
 0x247   : > { %v1572_v44 = vpop.f32.mrf.mxu1 }
 0x248   : > { %1916 = vst [vmem:[%s3420_s9 + $0xa0] sm:$0xff] %v1672_v10  ;;  %v1674_v37 = vadd.f32 %v1673_v34, %v1572_v44  ;;  %v1677_v61 = vpop.f32.mrf.mxu0 }
 0x249   : > { %v1576_v52 = vpop.f32.mrf.mxu1 }
 0x24a   : > { %1917 = vst [vmem:[%s3420_s9 + $0xa8] sm:$0xff] %v1674_v37  ;;  %v1678_v45 = vadd.f32 %v1677_v61, %v1576_v52  ;;  %v1679_v59 = vpop.f32.mrf.mxu0 }
 0x24b   : > { %v1578_v0 = vpop.f32.mrf.mxu1 }
 0x24c   : > { %1924 = vst [vmem:[%s3420_s9 + $0xe0] sm:$0xff] %v1678_v45  ;;  %v1680_v38 = vadd.f32 %v1679_v59, %v1578_v0  ;;  %v1683_v18 = vpop.f32.mrf.mxu0 }
 0x24d   : > { %v1582_v7 = vpop.f32.mrf.mxu1 }
 0x24e   : > { %1925 = vst [vmem:[%s3420_s9 + $0xe8] sm:$0xff] %v1680_v38  ;;  %v1684_v32 = vadd.f32 %v1683_v18, %v1582_v7  ;;  %v1685_v63 = vpop.f32.mrf.mxu0 }
 0x24f   : > { %v1584_v12 = vpop.f32.mrf.mxu1 }
 0x250   : > { %1932 = vst [vmem:[%s3420_s9 + $0x120] sm:$0xff] %v1684_v32  ;;  %v1686_v43 = vadd.f32 %v1685_v63, %v1584_v12  ;;  %v1689_v36 = vpop.f32.mrf.mxu0 }
 0x251   : > { %v1588_v19 = vpop.f32.mrf.mxu1 }
 0x252   : > { %1933 = vst [vmem:[%s3420_s9 + $0x128] sm:$0xff] %v1686_v43  ;;  %v1690_v50 = vadd.f32 %v1689_v36, %v1588_v19  ;;  %v1691_v47 = vpop.f32.mrf.mxu0 }
 0x253   : > { %v1590_v28 = vpop.f32.mrf.mxu1 }
 0x254   : > { %1940 = vst [vmem:[%s3420_s9 + $0x160] sm:$0xff] %v1690_v50  ;;  %v1692_v6 = vadd.f32 %v1691_v47, %v1590_v28 }
 0x255   : > { %v1861_v27 = vpop.f32.mrf.mxu1 }
 0x256   : > { %1941 = vst [vmem:[%s3420_s9 + $0x168] sm:$0xff] %v1692_v6  ;;  %v1760_v17 = vpop.f32.mrf.mxu0 }
 0x257   : > { %v1862_v20 = vadd.f32 %v1861_v27, %v1760_v17  ;;  %v1863_v22 = vpop.f32.mrf.mxu1 }
 0x258   : > { %v1762_v3 = vpop.f32.mrf.mxu0 }
 0x259   : > { %1902 = vst [vmem:[%s3420_s9 + $0x30] sm:$0xff] %v1862_v20  ;;  %v1864_v62 = vadd.f32 %v1863_v22, %v1762_v3  ;;  %v1867_v56 = vpop.f32.mrf.mxu1 }
 0x25a   : > { %v1766_v4 = vpop.f32.mrf.mxu0 }
 0x25b   : > { %1903 = vst [vmem:[%s3420_s9 + $0x38] sm:$0xff] %v1864_v62  ;;  %v1868_v9 = vadd.f32 %v1867_v56, %v1766_v4  ;;  %v1869_v26 = vpop.f32.mrf.mxu1 }
 0x25c   : > { %v1768_v21 = vpop.f32.mrf.mxu0 }
 0x25d   : > { %1910 = vst [vmem:[%s3420_s9 + $0x70] sm:$0xff] %v1868_v9  ;;  %v1870_v55 = vadd.f32 %v1869_v26, %v1768_v21  ;;  %v1873_v1 = vpop.f32.mrf.mxu1 }
 0x25e   : > { %v1772_v31 = vpop.f32.mrf.mxu0 }
 0x25f   : > { %1911 = vst [vmem:[%s3420_s9 + $0x78] sm:$0xff] %v1870_v55  ;;  %v1874_v5 = vadd.f32 %v1873_v1, %v1772_v31  ;;  %v1875_v33 = vpop.f32.mrf.mxu1 }
 0x260   : > { %v1774_v14 = vpop.f32.mrf.mxu0 }
 0x261   : > { %1918 = vst [vmem:[%s3420_s9 + $0xb0] sm:$0xff] %v1874_v5  ;;  %v1876_v46 = vadd.f32 %v1875_v33, %v1774_v14  ;;  %v1879_v42 = vpop.f32.mrf.mxu1 }
 0x262   : > { %v1778_v15 = vpop.f32.mrf.mxu0 }
 0x263   : > { %1919 = vst [vmem:[%s3420_s9 + $0xb8] sm:$0xff] %v1876_v46  ;;  %v1880_v24 = vadd.f32 %v1879_v42, %v1778_v15  ;;  %v1881_v57 = vpop.f32.mrf.mxu1 }
 0x264   : > { %v1780_v35 = vpop.f32.mrf.mxu0 }
 0x265   : > { %1926 = vst [vmem:[%s3420_s9 + $0xf0] sm:$0xff] %v1880_v24  ;;  %v1882_v29 = vadd.f32 %v1881_v57, %v1780_v35  ;;  %v1885_v8 = vpop.f32.mrf.mxu1 }
 0x266   : > { %v1784_v53 = vpop.f32.mrf.mxu0 }
 0x267   : > { %1927 = vst [vmem:[%s3420_s9 + $0xf8] sm:$0xff] %v1882_v29  ;;  %v1886_v41 = vadd.f32 %v1885_v8, %v1784_v53  ;;  %v1887_v49 = vpop.f32.mrf.mxu1 }
 0x268   : > { %v1786_v25 = vpop.f32.mrf.mxu0 }
 0x269   : > { %1934 = vst [vmem:[%s3420_s9 + $0x130] sm:$0xff] %v1886_v41  ;;  %v1888_v11 = vadd.f32 %v1887_v49, %v1786_v25  ;;  %v1891_v58 = vpop.f32.mrf.mxu1 }
 0x26a   : > { %v1790_v39 = vpop.f32.mrf.mxu0 }
 0x26b   : > { %1935 = vst [vmem:[%s3420_s9 + $0x138] sm:$0xff] %v1888_v11  ;;  %v1892_v40 = vadd.f32 %v1891_v58, %v1790_v39  ;;  %v1893_v13 = vpop.f32.mrf.mxu1  ;;  %1951 = sbr.rel (!%p3589_p5) target bundleno = 653 (0x28d), region = 44 }
 0x26c   : > { %v1792_v51 = vpop.f32.mrf.mxu0 }
 0x26d   : > { %1942 = vst [vmem:[%s3420_s9 + $0x170] sm:$0xff] %v1892_v40  ;;  %v1894_v60 = vadd.f32 %v1893_v13, %v1792_v51 }
 0x26f   : > { %1943 = vst [vmem:[%s3420_s9 + $0x178] sm:$0xff] %v1894_v60 }
 0x270   : > { %s3601_s18 = smov (!%p1954_p0, %s1953_s18), 8 }
 0x271   : > { %s3477_s24 = smul.u32 768, %s3601_s18 }
 0x273   : > { %s1958_s19 = ssub.s32 6144, %s3477_s24 }
 0x274   : > { %1959 = vsyncadd %s1945_s11, %s1958_s19  ;;  %p2120_p12 = scmp.ne.s32.totalorder %s3477_s24, 0  ;;  %s2128_s26 = sshll.u32 %s2354_s15, 10 }
 0x275   : > { %s3487_s23 = scalar_lea.hbm %s3546_s3, %s2128_s26  ;;  %s2122_s29 = sshll.u32 %s3601_s18, 3 }
 0x276   : > { %s1967_s21 = sshll.u32 %s3420_s9, 4  ;;  %s2372_s6 = smov [#allocation7]   ;;  %s3491_s21 = int_to_ptr.vmem [resolvable:$true] %s1967_s21 }
 0x277   : > { %s2278_s30 = scalar_lea.vmem %s3491_s21, %s3477_s24  ;;  %s2282_s7 = sshll.u32 %s2372_s6, 4  ;;  %s2283_s7 = int_to_ptr.vmem [resolvable:$false] %s2282_s7 }
 0x278   : > { %p2279_p8 = scmp.ne.s32.totalorder %s3491_s21, %s2278_s30  ;;  %s2284_s15 = scalar_lea.vmem %s2283_s7, 12288 }
 0x279   : > { %p2285_p11 = scmp.lt.s32.totalorder %s3491_s21, %s2283_s7  ;;  %p2286_p1 = scmp.lt.s32.totalorder %s2284_s15, %s2278_s30 }
 0x27a   : > { %p2280_p4 = pnand %p2279_p8, %p2120_p12 }
 0x27b   : > { %p2287_p2 = por %p2286_p1, %p2285_p11 }
 0x27c   : > { %p2281_p9 = pneg %p2280_p4 }
 0x27e   : > { %p2288_p6 = pnand %p2287_p2, %p2281_p9 }
 0x280   : > { %2291 = shalt.err (!%p2288_p6)
}
 0x281   : > { %s2292_s8 = scalar_lea.hbm %s3487_s23, %s3477_s24  ;;  %s2296_s9 = scalar_lea.hbm %s3546_s3, 9984 }
 0x282   : > { %p2293_p3 = scmp.ne.s32.totalorder %s3487_s23, %s2292_s8  ;;  %p2297_p5 = scmp.lt.s32.totalorder %s3487_s23, %s3546_s3 }
 0x283   : > { %p2298_p0 = scmp.lt.s32.totalorder %s2296_s9, %s2292_s8 }
 0x284   : > { %p2294_p7 = pnand %p2293_p3, %p2120_p12 }
 0x285   : > { %p2299_p8 = por %p2298_p0, %p2297_p5 }
 0x286   : > { %p2295_p10 = pneg %p2294_p7 }
 0x288   : > { %p2300_p4 = pnand %p2299_p8, %p2295_p10 }
 0x28a   : > { %2303 = shalt.err (!%p2300_p4)
}
 0x28b   : > { %s2373_s26 = smov 1024   ;;  %s2374_s22 = smov 1664  }
 0x28c   : > { %1973 = dma.vmem_to_hbm [thread:$0]  (%p2120_p12), %s3491_s21, %s3477_s24, %s3487_s23, %s1945_s11, %s2373_s26, %s2374_s22, %s2122_s29  }
 0x28d PF: > { %s1982_s5 = sand.u32 1, %s2342_s12   ;;  %p3590_p9 = scmp.ne.s32.totalorder %s3568_s28, 0 }
 0x28e   : > { %s1983_s30 = scalar_lea.sflag [#allocation4], %s1982_s5 }
 0x28f   : > { %p2143_p11 = pnand %p2086_p13, %p3590_p9 }
 0x291   : > { %p2144_p1 = pneg %p2143_p11 }
 0x293   : > { %2337 = dma.done.wait (%p2144_p1), %s1983_s30, 6144  }
 0x294   : > { %2339 = vsyncadd (%p2144_p1), %s1983_s30, 4294961152  ;;  %s20_s17 = sadd.s32 1, %s2362_s17   ;;  %s3591_s12 = smov %s2346_s13 }
 0x295   : > { %p17_p2 = scmp.ge.s32.totalorder %s20_s17, 4   ;;  %s3592_s13 = smov %s2350_s14 }
 0x296   : > { %s3593_s14 = smov %s2457_s27  ;;  %s3594_s15 = smov %s2358_s16 }
 0x297   : > { %s3595_s16 = smov %s3597_s20  ;;  %19 = sbr.rel (!%p17_p2) target bundleno = 9 (0x9), region = 85 }
 0x29c   :  { %1988 = vsyncpa [#allocation3], 1 }
 0x29d   :  { %1990 = vsyncpa [#allocation3 + $0x1], 1 }
 0x29e   :  { %1991 = vsyncpa [#allocation6], 1 }
 0x29f   :  { %1993 = vsyncpa [#allocation6 + $0x1], 1 }
 0x2a0   :  { %1994 = vsyncpa [#allocation4], 1 }
 0x2a1   :  { %1996 = vsyncpa [#allocation4 + $0x1], 1 }

</bundles_post_ra>
